<compile_context>
chip_gen: v7x
topology: tpu7x:2x2x1
jax: 0.10.0
libtpu: 0.0.40
codegen_flags: <defaults>
</compile_context>

<pallas_src>
import functools

import jax
import jax.numpy as jnp
from jax.experimental import pallas as pl
from jax.experimental.pallas import tpu as pltpu

KERNEL_SIZE = 7
PAD = KERNEL_SIZE // 2
LN_EPS = 1e-5
BN_EPS = 1e-5

# Packed per-channel vector rows (width E)
_BO, _C1, _C2, _FB2, _LNFG, _LNFB = range(6)
# Packed per-hidden vector rows (width hidden)
_FB1, _LN1G, _LN1B = range(3)


def _prepare_params(params, num_heads):
    """Fold eval-mode BatchNorm + softmax scale into weights; pack small vectors."""
    E = params["wo"].shape[0]
    scale = 1.0 / ((E // num_heads) ** 0.5)
    wqkv = jnp.stack([params["wq"] * scale, params["wk"], params["wv"]])          # (3,E,E)
    bqkv = jnp.concatenate([params["bq"] * scale, params["bk"], params["bv"]], 0)  # (3,E)
    dww = params["dww"] * params["bn1s"]                         # BN1 scale folded into taps
    c1 = params["dwb"] * params["bn1s"] + params["bn1b"]         # conv bias + BN1 shift
    pww = params["pww"] * params["bn2s"]                         # BN2 scale folded (columns)
    c2 = params["pwb"] * params["bn2s"] + params["bn2b"]
    evec = jnp.concatenate([params["bo"], c1, c2, params["fb2"],
                            params["lnfg"], params["lnfb"]], 0)                    # (6,E)
    hvec = jnp.concatenate([params["fb1"], params["ln1g"], params["ln1b"]], 0)     # (3,H)
    return [wqkv, bqkv, params["wo"], dww, pww, params["fw1"], params["fw2"], evec, hvec]


def _mixed_attention_kernel(
        x_ref, wqkv_ref, bqkv_ref, wo_ref, dww_ref, pww_ref, fw1_ref, fw2_ref,
        evec_ref, hvec_ref, out_ref, *, num_heads, seq_len, use_fast_math):
    """One grid step = one batch chunk, rows flattened to (chunk*seq, E)."""
    x = x_ref[...].astype(jnp.float32)                    # (R, E), R = chunk*seq
    R, E = x.shape
    L = seq_len
    BB = R // L                                           # batch elements in this chunk
    H = num_heads
    D = E // H

    mdt = jnp.bfloat16 if use_fast_math else jnp.float32  # MXU operand dtype

    def mm(a, b):                                          # 2-D dot, f32 accumulation
        return jnp.dot(a.astype(mdt), b.astype(mdt), preferred_element_type=jnp.float32)

    def bmm(spec, a, b):                                   # batched dot (einsum)
        return jnp.einsum(spec, a.astype(mdt), b.astype(mdt),
                          preferred_element_type=jnp.float32)

    # ---------------- global multi-head self-attention (dropout = identity) -----------
    # 1/sqrt(D) is pre-folded into Wq/bq, so scores are plain q @ k^T.
    q = mm(x, wqkv_ref[0]) + bqkv_ref[0:1, :]
    k = mm(x, wqkv_ref[1]) + bqkv_ref[1:2, :]
    v = mm(x, wqkv_ref[2]) + bqkv_ref[2:3, :]
    q3 = q.reshape(BB, L, E)
    k3 = k.reshape(BB, L, E)
    v3 = v.reshape(BB, L, E)

    lane = jax.lax.broadcasted_iota(jnp.int32, (1, 1, E), 2)
    attn = jnp.zeros((BB, L, E), jnp.float32)              # heads re-concatenated in place
    for h in range(H):                                     # static, small head count
        hm = (lane >= h * D) & (lane < (h + 1) * D)        # lane mask (no 8-lane slices)
        s = bmm("bqe,bke->bqk", jnp.where(hm, q3, 0.0), k3)        # (BB, L, L) head scores
        s = s - jnp.max(s, axis=-1, keepdims=True)
        p = jnp.exp(s)
        inv = pl.reciprocal(jnp.sum(p, axis=-1, keepdims=True), approx=use_fast_math)
        attn = attn + bmm("bqk,bke->bqe", p * inv, jnp.where(hm, v3, 0.0))
    # single fat out-projection over the concatenated heads (K = E, not K = D)
    global_out = mm(attn.reshape(R, E), wo_ref[...]) + evec_ref[_BO:_BO + 1, :]

    # ---------------- local branch: depthwise conv (+BN1) + ReLU + 1x1 conv (+BN2) ----
    # No padded HBM copy: shift rows with pltpu.roll (XLU) and mask sequence borders.
    pos = jax.lax.broadcasted_iota(jnp.int32, (R, 1), 0) % L       # index within sequence
    conv = x * dww_ref[PAD:PAD + 1, :]                             # centre tap, always valid
    for kk in range(KERNEL_SIZE):
        t = kk - PAD                                               # tap offset in [-PAD, PAD]
        if t == 0:
            continue
        shifted = pltpu.roll(x, shift=(-t) % R, axis=0)            # shifted[r] = x[(r+t) % R]
        valid = (pos + t >= 0) & (pos + t < L)                     # stay inside own sequence
        conv = conv + jnp.where(valid, shifted, 0.0) * dww_ref[kk:kk + 1, :]
    h1 = jnp.maximum(conv + evec_ref[_C1:_C1 + 1, :], 0.0)
    local_out = jnp.maximum(mm(h1, pww_ref[...]) + evec_ref[_C2:_C2 + 1, :], 0.0)

    # ---------------- fusion MLP: Linear(2E->Hd) split (no concat), LN, ReLU, Linear --
    fw1 = fw1_ref[...]
    f1 = (mm(global_out, fw1[:E, :]) + mm(local_out, fw1[E:, :])
          + hvec_ref[_FB1:_FB1 + 1, :])
    mu = jnp.mean(f1, axis=-1, keepdims=True)
    var = jnp.mean(jnp.square(f1 - mu), axis=-1, keepdims=True)
    f1 = ((f1 - mu) * jax.lax.rsqrt(var + LN_EPS) * hvec_ref[_LN1G:_LN1G + 1, :]
          + hvec_ref[_LN1B:_LN1B + 1, :])
    f1 = jnp.maximum(f1, 0.0)
    fused = mm(f1, fw2_ref[...]) + evec_ref[_FB2:_FB2 + 1, :]
    # Dropout(0.2) is identity in inference mode.

    # ---------------- residual + final LayerNorm --------------------------------------
    y = x + fused
    mu2 = jnp.mean(y, axis=-1, keepdims=True)
    var2 = jnp.mean(jnp.square(y - mu2), axis=-1, keepdims=True)
    out = ((y - mu2) * jax.lax.rsqrt(var2 + LN_EPS) * evec_ref[_LNFG:_LNFG + 1, :]
           + evec_ref[_LNFB:_LNFB + 1, :])
    out_ref[...] = out.astype(out_ref.dtype)


def mixed_attention_forward(x, params, num_heads, *, use_fast_math=True,
                            max_grid_splits=2, min_rows_per_step=32):
    """MixedAttentionModule forward as a single pallas_call.

    The batch is split into at most `max_grid_splits` chunks (a "parallel" grid axis so
    both v7x TensorCores get work), but never below `min_rows_per_step` flattened rows
    per step, keeping the MXU sublane-filled.
    """
    B, L, E = x.shape
    rows = B * L

    nsteps = max(1, min(max_grid_splits, B, rows // min_rows_per_step))
    while nsteps > 1 and (B % nsteps != 0 or ((B // nsteps) * L) % 8 != 0):
        nsteps -= 1
    rb = (B // nsteps) * L                                  # flattened rows per grid step

    prep = _prepare_params(params, num_heads)
    x2 = x.reshape(rows, E)                                 # sublane-packed row layout

    in_specs = [pl.BlockSpec((rb, E), lambda i: (i, 0))]
    # Parameters use a constant index map -> DMA'd once, reused every grid step.
    for p in prep:
        in_specs.append(pl.BlockSpec(p.shape, lambda i, nd=p.ndim: (0,) * nd))

    kernel = functools.partial(_mixed_attention_kernel, num_heads=num_heads,
                               seq_len=L, use_fast_math=use_fast_math)
    out2 = pl.pallas_call(
        kernel,
        out_shape=jax.ShapeDtypeStruct((rows, E), x.dtype),
        grid=(nsteps,),
        in_specs=in_specs,
        out_specs=pl.BlockSpec((rb, E), lambda i: (i, 0)),
        compiler_params=pltpu.CompilerParams(
            dimension_semantics=("parallel",),              # v7x: both TCs split the batch
            vmem_limit_bytes=32 * 1024 * 1024),
    )(x2, *prep)
    return out2.reshape(B, L, E)


def init_params(key, E, hidden, heads, ksize=KERNEL_SIZE):
    keys = jax.random.split(key, 32)
    it = iter(keys)
    f32 = jnp.float32

    def nrm(shape, scale):
        return (scale * jax.random.normal(next(it), shape)).astype(f32)

    def unif(shape, lo, hi):
        return jax.random.uniform(next(it), shape, minval=lo, maxval=hi).astype(f32)

    p = {}
    s = 1.0 / (E ** 0.5)
    # MultiheadAttention: in_proj / out_proj weights stored transposed for x @ W
    p["wq"], p["wk"], p["wv"] = nrm((E, E), s), nrm((E, E), s), nrm((E, E), s)
    p["bq"], p["bk"], p["bv"] = nrm((1, E), 0.02), nrm((1, E), 0.02), nrm((1, E), 0.02)
    p["wo"], p["bo"] = nrm((E, E), s), nrm((1, E), 0.02)
    # depthwise Conv1d weight (E,1,K) stored as (K, E); pointwise Conv1d (E,E,1) as (E_in, E_out)
    p["dww"], p["dwb"] = nrm((ksize, E), 1.0 / (ksize ** 0.5)), nrm((1, E), 0.02)
    p["pww"], p["pwb"] = nrm((E, E), s), nrm((1, E), 0.02)
    # eval-mode BatchNorm1d folded into per-channel scale/shift
    for tag in ("bn1", "bn2"):
        gamma = 1.0 + nrm((1, E), 0.1)
        beta = nrm((1, E), 0.1)
        mean = nrm((1, E), 0.1)
        var = unif((1, E), 0.5, 1.5)
        sc = gamma * jax.lax.rsqrt(var + BN_EPS)
        p[tag + "s"], p[tag + "b"] = sc, beta - mean * sc
    # fusion MLP + LayerNorms
    p["fw1"], p["fb1"] = nrm((2 * E, hidden), 1.0 / ((2 * E) ** 0.5)), nrm((1, hidden), 0.02)
    p["ln1g"], p["ln1b"] = 1.0 + nrm((1, hidden), 0.1), nrm((1, hidden), 0.1)
    p["fw2"], p["fb2"] = nrm((hidden, E), 1.0 / (hidden ** 0.5)), nrm((1, E), 0.02)
    p["lnfg"], p["lnfb"] = 1.0 + nrm((1, E), 0.1), nrm((1, E), 0.1)
    return p


def reference_forward(x, p, num_heads):
    """Plain-JAX reference mirroring the PyTorch module in eval mode."""
    hp = jax.lax.Precision.HIGHEST
    B, L, E = x.shape
    D = E // num_heads
    q = jnp.dot(x, p["wq"], precision=hp) + p["bq"]
    k = jnp.dot(x, p["wk"], precision=hp) + p["bk"]
    v = jnp.dot(x, p["wv"], precision=hp) + p["bv"]
    qh = q.reshape(B, L, num_heads, D).transpose(0, 2, 1, 3)
    kh = k.reshape(B, L, num_heads, D).transpose(0, 2, 1, 3)
    vh = v.reshape(B, L, num_heads, D).transpose(0, 2, 1, 3)
    s = jnp.einsum("bhqd,bhkd->bhqk", qh, kh, precision=hp) / (D ** 0.5)
    a = jax.nn.softmax(s, axis=-1)
    o = jnp.einsum("bhqk,bhkd->bhqd", a, vh, precision=hp)
    o = o.transpose(0, 2, 1, 3).reshape(B, L, E)
    global_out = jnp.dot(o, p["wo"], precision=hp) + p["bo"]

    xp = jnp.pad(x, ((0, 0), (PAD, PAD), (0, 0)))
    conv = sum(xp[:, kk:kk + L, :] * p["dww"][kk] for kk in range(KERNEL_SIZE)) + p["dwb"]
    h1 = jnp.maximum(conv * p["bn1s"] + p["bn1b"], 0.0)
    h2 = jnp.dot(h1, p["pww"], precision=hp) + p["pwb"]
    local_out = jnp.maximum(h2 * p["bn2s"] + p["bn2b"], 0.0)

    combined = jnp.concatenate([global_out, local_out], axis=-1)
    f1 = jnp.dot(combined, p["fw1"], precision=hp) + p["fb1"]
    mu = f1.mean(-1, keepdims=True)
    var = ((f1 - mu) ** 2).mean(-1, keepdims=True)
    f1 = (f1 - mu) * jax.lax.rsqrt(var + LN_EPS) * p["ln1g"] + p["ln1b"]
    f1 = jnp.maximum(f1, 0.0)
    fused = jnp.dot(f1, p["fw2"], precision=hp) + p["fb2"]
    y = x + fused
    mu = y.mean(-1, keepdims=True)
    var = ((y - mu) ** 2).mean(-1, keepdims=True)
    return (y - mu) * jax.lax.rsqrt(var + LN_EPS) * p["lnfg"] + p["lnfb"]


if __name__ == "__main__":
    B, L, E = 2, 16, 32           # batch, seq, input_dim (embed)
    HEADS, HIDDEN = 4, 64         # global_heads, hidden_dim

    key = jax.random.PRNGKey(0)
    kx, kp = jax.random.split(key)
    x = jax.random.normal(kx, (B, L, E), dtype=jnp.float32)
    params = init_params(kp, E, HIDDEN, HEADS)

    ref = reference_forward(x, params, HEADS)

    # Exact path: f32 MXU operands + exact softmax normalization -> tight tolerance.
    out = jax.block_until_ready(
        mixed_attention_forward(x, params, HEADS, use_fast_math=False))
    assert out.shape == (B, L, E)
    if not jnp.allclose(out, ref, atol=2e-3, rtol=2e-3):
        raise AssertionError("Pallas kernel (exact path) mismatch vs reference")

    # Fast path (default): bf16 MXU operands (f32 accumulation) + EUP approx reciprocal.
    # Tolerance budget: bf16 operand rounding (~2^-8) through 4 stacked K=32..64 matmuls.
    out_fast = jax.block_until_ready(mixed_attention_forward(x, params, HEADS))
    if not jnp.allclose(out_fast, ref, atol=5e-2, rtol=5e-2):
        raise AssertionError("Pallas kernel (fast-math path) mismatch vs reference")

    print("KERNEL_OK")
</pallas_src>

<mosaic_0001>
module attributes {stable_mosaic.version = 11 : i64} {
  func.func @_mixed_attention_kernel(%arg0: i32, %arg1: memref<32x32xf32, #tpu.memory_space<vmem>>, %arg2: memref<3x32x32xf32, #tpu.memory_space<vmem>>, %arg3: memref<3x32xf32, #tpu.memory_space<vmem>>, %arg4: memref<32x32xf32, #tpu.memory_space<vmem>>, %arg5: memref<7x32xf32, #tpu.memory_space<vmem>>, %arg6: memref<32x32xf32, #tpu.memory_space<vmem>>, %arg7: memref<64x64xf32, #tpu.memory_space<vmem>>, %arg8: memref<64x32xf32, #tpu.memory_space<vmem>>, %arg9: memref<6x32xf32, #tpu.memory_space<vmem>>, %arg10: memref<3x64xf32, #tpu.memory_space<vmem>>, %arg11: memref<32x32xf32, #tpu.memory_space<vmem>>) attributes {dimension_semantics = [#tpu.dimension_semantics<parallel>], iteration_bounds = array<i64: 1>, scalar_prefetch = 0 : i64, scratch_operands = 0 : i64, tpu.core_type = #tpu.core_type<tc>, window_params = [{transform_indices = @transform_0, window_bounds = array<i64: 32, 32>}, {pipeline_mode = #tpu.pipeline_mode<synchronous>, transform_indices = @transform_1, window_bounds = array<i64: 3, 32, 32>}, {pipeline_mode = #tpu.pipeline_mode<synchronous>, transform_indices = @transform_2, window_bounds = array<i64: 3, 32>}, {pipeline_mode = #tpu.pipeline_mode<synchronous>, transform_indices = @transform_3, window_bounds = array<i64: 32, 32>}, {pipeline_mode = #tpu.pipeline_mode<synchronous>, transform_indices = @transform_4, window_bounds = array<i64: 7, 32>}, {pipeline_mode = #tpu.pipeline_mode<synchronous>, transform_indices = @transform_5, window_bounds = array<i64: 32, 32>}, {pipeline_mode = #tpu.pipeline_mode<synchronous>, transform_indices = @transform_6, window_bounds = array<i64: 64, 64>}, {pipeline_mode = #tpu.pipeline_mode<synchronous>, transform_indices = @transform_7, window_bounds = array<i64: 64, 32>}, {pipeline_mode = #tpu.pipeline_mode<synchronous>, transform_indices = @transform_8, window_bounds = array<i64: 6, 32>}, {pipeline_mode = #tpu.pipeline_mode<synchronous>, transform_indices = @transform_9, window_bounds = array<i64: 3, 64>}, {transform_indices = @transform_10, window_bounds = array<i64: 32, 32>}]} {
    %c0 = arith.constant 0 : index
    %c0_0 = arith.constant 0 : index
    %0 = vector.load %arg1[%c0, %c0_0] : memref<32x32xf32, #tpu.memory_space<vmem>>, vector<32x32xf32>
    %c0_1 = arith.constant 0 : index
    %c0_2 = arith.constant 0 : index
    %c0_3 = arith.constant 0 : index
    %1 = vector.load %arg2[%c0_1, %c0_2, %c0_3] : memref<3x32x32xf32, #tpu.memory_space<vmem>>, vector<1x32x32xf32>
    %2 = vector.shape_cast %1 : vector<1x32x32xf32> to vector<32x32xf32>
    %cst = arith.constant dense<0.000000e+00> : vector<32x32xf32>
    %3 = tpu.matmul %0, %2, %cst {dimension_numbers = #tpu.dot_dimension_numbers<[1], [0], [0], [1], [0, 0, 1, 1], [], []>} : vector<32x32xf32>, vector<32x32xf32>, vector<32x32xf32> -> vector<32x32xf32>
    %c0_4 = arith.constant 0 : index
    %c0_5 = arith.constant 0 : index
    %4 = vector.load %arg3[%c0_4, %c0_5] : memref<3x32xf32, #tpu.memory_space<vmem>>, vector<1x32xf32>
    %5 = vector.broadcast %4 : vector<1x32xf32> to vector<32x32xf32>
    %6 = arith.addf %3, %5 : vector<32x32xf32>
    %c1 = arith.constant 1 : index
    %c0_6 = arith.constant 0 : index
    %c0_7 = arith.constant 0 : index
    %7 = vector.load %arg2[%c1, %c0_6, %c0_7] : memref<3x32x32xf32, #tpu.memory_space<vmem>>, vector<1x32x32xf32>
    %8 = vector.shape_cast %7 : vector<1x32x32xf32> to vector<32x32xf32>
    %cst_8 = arith.constant dense<0.000000e+00> : vector<32x32xf32>
    %9 = tpu.matmul %0, %8, %cst_8 {dimension_numbers = #tpu.dot_dimension_numbers<[1], [0], [0], [1], [0, 0, 1, 1], [], []>} : vector<32x32xf32>, vector<32x32xf32>, vector<32x32xf32> -> vector<32x32xf32>
    %c1_9 = arith.constant 1 : index
    %c0_10 = arith.constant 0 : index
    %10 = vector.load %arg3[%c1_9, %c0_10] : memref<3x32xf32, #tpu.memory_space<vmem>>, vector<1x32xf32>
    %11 = vector.broadcast %10 : vector<1x32xf32> to vector<32x32xf32>
    %12 = arith.addf %9, %11 : vector<32x32xf32>
    %c2 = arith.constant 2 : index
    %c0_11 = arith.constant 0 : index
    %c0_12 = arith.constant 0 : index
    %13 = vector.load %arg2[%c2, %c0_11, %c0_12] : memref<3x32x32xf32, #tpu.memory_space<vmem>>, vector<1x32x32xf32>
    %14 = vector.shape_cast %13 : vector<1x32x32xf32> to vector<32x32xf32>
    %cst_13 = arith.constant dense<0.000000e+00> : vector<32x32xf32>
    %15 = tpu.matmul %0, %14, %cst_13 {dimension_numbers = #tpu.dot_dimension_numbers<[1], [0], [0], [1], [0, 0, 1, 1], [], []>} : vector<32x32xf32>, vector<32x32xf32>, vector<32x32xf32> -> vector<32x32xf32>
    %c2_14 = arith.constant 2 : index
    %c0_15 = arith.constant 0 : index
    %16 = vector.load %arg3[%c2_14, %c0_15] : memref<3x32xf32, #tpu.memory_space<vmem>>, vector<1x32xf32>
    %17 = vector.broadcast %16 : vector<1x32xf32> to vector<32x32xf32>
    %18 = arith.addf %15, %17 : vector<32x32xf32>
    %19 = vector.shape_cast %6 : vector<32x32xf32> to vector<2x16x32xf32>
    %20 = vector.shape_cast %12 : vector<32x32xf32> to vector<2x16x32xf32>
    %21 = vector.shape_cast %18 : vector<32x32xf32> to vector<2x16x32xf32>
    %22 = tpu.iota {dimensions = array<i32: 2>} : vector<1x1x32xi32>
    %cst_16 = arith.constant 0.000000e+00 : f32
    %23 = vector.broadcast %cst_16 : f32 to vector<2x16x32xf32>
    %c0_i32 = arith.constant 0 : i32
    %24 = vector.broadcast %c0_i32 : i32 to vector<1x1x32xi32>
    %25 = arith.cmpi sge, %22, %24 : vector<1x1x32xi32>
    %c8_i32 = arith.constant 8 : i32
    %26 = vector.broadcast %c8_i32 : i32 to vector<1x1x32xi32>
    %27 = arith.cmpi slt, %22, %26 : vector<1x1x32xi32>
    %28 = arith.andi %25, %27 : vector<1x1x32xi1>
    %cst_17 = arith.constant 0.000000e+00 : f32
    %29 = vector.shape_cast %28 : vector<1x1x32xi1> to vector<1x1x32xi1>
    %30 = vector.broadcast %29 : vector<1x1x32xi1> to vector<2x16x32xi1>
    %31 = vector.broadcast %cst_17 : f32 to vector<2x16x32xf32>
    %32 = arith.select %30, %19, %31 : vector<2x16x32xi1>, vector<2x16x32xf32>
    "tpu.trace_start"() <{level = 10 : i32, message = "bqe,bke->bqk"}> : () -> ()
    %cst_18 = arith.constant dense<0.000000e+00> : vector<2x16x16xf32>
    %33 = tpu.matmul %32, %20, %cst_18 {dimension_numbers = #tpu.dot_dimension_numbers<[2], [2], [1], [1], [0, 0, 0, 1, 1, 1], [0], [0]>} : vector<2x16x32xf32>, vector<2x16x32xf32>, vector<2x16x16xf32> -> vector<2x16x16xf32>
    "tpu.trace_stop"() : () -> ()
    %cst_19 = arith.constant dense<0xFF800000> : vector<2x16xf32>
    %34 = vector.multi_reduction <maximumf>, %33, %cst_19 [2] : vector<2x16x16xf32> to vector<2x16xf32>
    %35 = vector.shape_cast %34 : vector<2x16xf32> to vector<2x16x1xf32>
    %36 = vector.broadcast %35 : vector<2x16x1xf32> to vector<2x16x16xf32>
    %37 = arith.subf %33, %36 : vector<2x16x16xf32>
    %38 = math.exp %37 : vector<2x16x16xf32>
    %cst_20 = arith.constant dense<0.000000e+00> : vector<2x16xf32>
    %39 = vector.multi_reduction <add>, %38, %cst_20 [2] : vector<2x16x16xf32> to vector<2x16xf32>
    %40 = vector.shape_cast %39 : vector<2x16xf32> to vector<2x16x1xf32>
    %41 = tpu.reciprocal %40 : vector<2x16x1xf32> -> vector<2x16x1xf32>
    %42 = vector.broadcast %41 : vector<2x16x1xf32> to vector<2x16x16xf32>
    %43 = arith.mulf %38, %42 : vector<2x16x16xf32>
    %cst_21 = arith.constant 0.000000e+00 : f32
    %44 = vector.shape_cast %28 : vector<1x1x32xi1> to vector<1x1x32xi1>
    %45 = vector.broadcast %44 : vector<1x1x32xi1> to vector<2x16x32xi1>
    %46 = vector.broadcast %cst_21 : f32 to vector<2x16x32xf32>
    %47 = arith.select %45, %21, %46 : vector<2x16x32xi1>, vector<2x16x32xf32>
    "tpu.trace_start"() <{level = 10 : i32, message = "bqk,bke->bqe"}> : () -> ()
    %cst_22 = arith.constant dense<0.000000e+00> : vector<2x16x32xf32>
    %48 = tpu.matmul %43, %47, %cst_22 {dimension_numbers = #tpu.dot_dimension_numbers<[2], [1], [1], [2], [0, 0, 0, 1, 1, 2], [0], [0]>} : vector<2x16x16xf32>, vector<2x16x32xf32>, vector<2x16x32xf32> -> vector<2x16x32xf32>
    "tpu.trace_stop"() : () -> ()
    %49 = arith.addf %23, %48 : vector<2x16x32xf32>
    %c8_i32_23 = arith.constant 8 : i32
    %50 = vector.broadcast %c8_i32_23 : i32 to vector<1x1x32xi32>
    %51 = arith.cmpi sge, %22, %50 : vector<1x1x32xi32>
    %c16_i32 = arith.constant 16 : i32
    %52 = vector.broadcast %c16_i32 : i32 to vector<1x1x32xi32>
    %53 = arith.cmpi slt, %22, %52 : vector<1x1x32xi32>
    %54 = arith.andi %51, %53 : vector<1x1x32xi1>
    %cst_24 = arith.constant 0.000000e+00 : f32
    %55 = vector.shape_cast %54 : vector<1x1x32xi1> to vector<1x1x32xi1>
    %56 = vector.broadcast %55 : vector<1x1x32xi1> to vector<2x16x32xi1>
    %57 = vector.broadcast %cst_24 : f32 to vector<2x16x32xf32>
    %58 = arith.select %56, %19, %57 : vector<2x16x32xi1>, vector<2x16x32xf32>
    "tpu.trace_start"() <{level = 10 : i32, message = "bqe,bke->bqk"}> : () -> ()
    %cst_25 = arith.constant dense<0.000000e+00> : vector<2x16x16xf32>
    %59 = tpu.matmul %58, %20, %cst_25 {dimension_numbers = #tpu.dot_dimension_numbers<[2], [2], [1], [1], [0, 0, 0, 1, 1, 1], [0], [0]>} : vector<2x16x32xf32>, vector<2x16x32xf32>, vector<2x16x16xf32> -> vector<2x16x16xf32>
    "tpu.trace_stop"() : () -> ()
    %cst_26 = arith.constant dense<0xFF800000> : vector<2x16xf32>
    %60 = vector.multi_reduction <maximumf>, %59, %cst_26 [2] : vector<2x16x16xf32> to vector<2x16xf32>
    %61 = vector.shape_cast %60 : vector<2x16xf32> to vector<2x16x1xf32>
    %62 = vector.broadcast %61 : vector<2x16x1xf32> to vector<2x16x16xf32>
    %63 = arith.subf %59, %62 : vector<2x16x16xf32>
    %64 = math.exp %63 : vector<2x16x16xf32>
    %cst_27 = arith.constant dense<0.000000e+00> : vector<2x16xf32>
    %65 = vector.multi_reduction <add>, %64, %cst_27 [2] : vector<2x16x16xf32> to vector<2x16xf32>
    %66 = vector.shape_cast %65 : vector<2x16xf32> to vector<2x16x1xf32>
    %67 = tpu.reciprocal %66 : vector<2x16x1xf32> -> vector<2x16x1xf32>
    %68 = vector.broadcast %67 : vector<2x16x1xf32> to vector<2x16x16xf32>
    %69 = arith.mulf %64, %68 : vector<2x16x16xf32>
    %cst_28 = arith.constant 0.000000e+00 : f32
    %70 = vector.shape_cast %54 : vector<1x1x32xi1> to vector<1x1x32xi1>
    %71 = vector.broadcast %70 : vector<1x1x32xi1> to vector<2x16x32xi1>
    %72 = vector.broadcast %cst_28 : f32 to vector<2x16x32xf32>
    %73 = arith.select %71, %21, %72 : vector<2x16x32xi1>, vector<2x16x32xf32>
    "tpu.trace_start"() <{level = 10 : i32, message = "bqk,bke->bqe"}> : () -> ()
    %cst_29 = arith.constant dense<0.000000e+00> : vector<2x16x32xf32>
    %74 = tpu.matmul %69, %73, %cst_29 {dimension_numbers = #tpu.dot_dimension_numbers<[2], [1], [1], [2], [0, 0, 0, 1, 1, 2], [0], [0]>} : vector<2x16x16xf32>, vector<2x16x32xf32>, vector<2x16x32xf32> -> vector<2x16x32xf32>
    "tpu.trace_stop"() : () -> ()
    %75 = arith.addf %49, %74 : vector<2x16x32xf32>
    %c16_i32_30 = arith.constant 16 : i32
    %76 = vector.broadcast %c16_i32_30 : i32 to vector<1x1x32xi32>
    %77 = arith.cmpi sge, %22, %76 : vector<1x1x32xi32>
    %c24_i32 = arith.constant 24 : i32
    %78 = vector.broadcast %c24_i32 : i32 to vector<1x1x32xi32>
    %79 = arith.cmpi slt, %22, %78 : vector<1x1x32xi32>
    %80 = arith.andi %77, %79 : vector<1x1x32xi1>
    %cst_31 = arith.constant 0.000000e+00 : f32
    %81 = vector.shape_cast %80 : vector<1x1x32xi1> to vector<1x1x32xi1>
    %82 = vector.broadcast %81 : vector<1x1x32xi1> to vector<2x16x32xi1>
    %83 = vector.broadcast %cst_31 : f32 to vector<2x16x32xf32>
    %84 = arith.select %82, %19, %83 : vector<2x16x32xi1>, vector<2x16x32xf32>
    "tpu.trace_start"() <{level = 10 : i32, message = "bqe,bke->bqk"}> : () -> ()
    %cst_32 = arith.constant dense<0.000000e+00> : vector<2x16x16xf32>
    %85 = tpu.matmul %84, %20, %cst_32 {dimension_numbers = #tpu.dot_dimension_numbers<[2], [2], [1], [1], [0, 0, 0, 1, 1, 1], [0], [0]>} : vector<2x16x32xf32>, vector<2x16x32xf32>, vector<2x16x16xf32> -> vector<2x16x16xf32>
    "tpu.trace_stop"() : () -> ()
    %cst_33 = arith.constant dense<0xFF800000> : vector<2x16xf32>
    %86 = vector.multi_reduction <maximumf>, %85, %cst_33 [2] : vector<2x16x16xf32> to vector<2x16xf32>
    %87 = vector.shape_cast %86 : vector<2x16xf32> to vector<2x16x1xf32>
    %88 = vector.broadcast %87 : vector<2x16x1xf32> to vector<2x16x16xf32>
    %89 = arith.subf %85, %88 : vector<2x16x16xf32>
    %90 = math.exp %89 : vector<2x16x16xf32>
    %cst_34 = arith.constant dense<0.000000e+00> : vector<2x16xf32>
    %91 = vector.multi_reduction <add>, %90, %cst_34 [2] : vector<2x16x16xf32> to vector<2x16xf32>
    %92 = vector.shape_cast %91 : vector<2x16xf32> to vector<2x16x1xf32>
    %93 = tpu.reciprocal %92 : vector<2x16x1xf32> -> vector<2x16x1xf32>
    %94 = vector.broadcast %93 : vector<2x16x1xf32> to vector<2x16x16xf32>
    %95 = arith.mulf %90, %94 : vector<2x16x16xf32>
    %cst_35 = arith.constant 0.000000e+00 : f32
    %96 = vector.shape_cast %80 : vector<1x1x32xi1> to vector<1x1x32xi1>
    %97 = vector.broadcast %96 : vector<1x1x32xi1> to vector<2x16x32xi1>
    %98 = vector.broadcast %cst_35 : f32 to vector<2x16x32xf32>
    %99 = arith.select %97, %21, %98 : vector<2x16x32xi1>, vector<2x16x32xf32>
    "tpu.trace_start"() <{level = 10 : i32, message = "bqk,bke->bqe"}> : () -> ()
    %cst_36 = arith.constant dense<0.000000e+00> : vector<2x16x32xf32>
    %100 = tpu.matmul %95, %99, %cst_36 {dimension_numbers = #tpu.dot_dimension_numbers<[2], [1], [1], [2], [0, 0, 0, 1, 1, 2], [0], [0]>} : vector<2x16x16xf32>, vector<2x16x32xf32>, vector<2x16x32xf32> -> vector<2x16x32xf32>
    "tpu.trace_stop"() : () -> ()
    %101 = arith.addf %75, %100 : vector<2x16x32xf32>
    %c24_i32_37 = arith.constant 24 : i32
    %102 = vector.broadcast %c24_i32_37 : i32 to vector<1x1x32xi32>
    %103 = arith.cmpi sge, %22, %102 : vector<1x1x32xi32>
    %c32_i32 = arith.constant 32 : i32
    %104 = vector.broadcast %c32_i32 : i32 to vector<1x1x32xi32>
    %105 = arith.cmpi slt, %22, %104 : vector<1x1x32xi32>
    %106 = arith.andi %103, %105 : vector<1x1x32xi1>
    %cst_38 = arith.constant 0.000000e+00 : f32
    %107 = vector.shape_cast %106 : vector<1x1x32xi1> to vector<1x1x32xi1>
    %108 = vector.broadcast %107 : vector<1x1x32xi1> to vector<2x16x32xi1>
    %109 = vector.broadcast %cst_38 : f32 to vector<2x16x32xf32>
    %110 = arith.select %108, %19, %109 : vector<2x16x32xi1>, vector<2x16x32xf32>
    "tpu.trace_start"() <{level = 10 : i32, message = "bqe,bke->bqk"}> : () -> ()
    %cst_39 = arith.constant dense<0.000000e+00> : vector<2x16x16xf32>
    %111 = tpu.matmul %110, %20, %cst_39 {dimension_numbers = #tpu.dot_dimension_numbers<[2], [2], [1], [1], [0, 0, 0, 1, 1, 1], [0], [0]>} : vector<2x16x32xf32>, vector<2x16x32xf32>, vector<2x16x16xf32> -> vector<2x16x16xf32>
    "tpu.trace_stop"() : () -> ()
    %cst_40 = arith.constant dense<0xFF800000> : vector<2x16xf32>
    %112 = vector.multi_reduction <maximumf>, %111, %cst_40 [2] : vector<2x16x16xf32> to vector<2x16xf32>
    %113 = vector.shape_cast %112 : vector<2x16xf32> to vector<2x16x1xf32>
    %114 = vector.broadcast %113 : vector<2x16x1xf32> to vector<2x16x16xf32>
    %115 = arith.subf %111, %114 : vector<2x16x16xf32>
    %116 = math.exp %115 : vector<2x16x16xf32>
    %cst_41 = arith.constant dense<0.000000e+00> : vector<2x16xf32>
    %117 = vector.multi_reduction <add>, %116, %cst_41 [2] : vector<2x16x16xf32> to vector<2x16xf32>
    %118 = vector.shape_cast %117 : vector<2x16xf32> to vector<2x16x1xf32>
    %119 = tpu.reciprocal %118 : vector<2x16x1xf32> -> vector<2x16x1xf32>
    %120 = vector.broadcast %119 : vector<2x16x1xf32> to vector<2x16x16xf32>
    %121 = arith.mulf %116, %120 : vector<2x16x16xf32>
    %cst_42 = arith.constant 0.000000e+00 : f32
    %122 = vector.shape_cast %106 : vector<1x1x32xi1> to vector<1x1x32xi1>
    %123 = vector.broadcast %122 : vector<1x1x32xi1> to vector<2x16x32xi1>
    %124 = vector.broadcast %cst_42 : f32 to vector<2x16x32xf32>
    %125 = arith.select %123, %21, %124 : vector<2x16x32xi1>, vector<2x16x32xf32>
    "tpu.trace_start"() <{level = 10 : i32, message = "bqk,bke->bqe"}> : () -> ()
    %cst_43 = arith.constant dense<0.000000e+00> : vector<2x16x32xf32>
    %126 = tpu.matmul %121, %125, %cst_43 {dimension_numbers = #tpu.dot_dimension_numbers<[2], [1], [1], [2], [0, 0, 0, 1, 1, 2], [0], [0]>} : vector<2x16x16xf32>, vector<2x16x32xf32>, vector<2x16x32xf32> -> vector<2x16x32xf32>
    "tpu.trace_stop"() : () -> ()
    %127 = arith.addf %101, %126 : vector<2x16x32xf32>
    %128 = vector.shape_cast %127 : vector<2x16x32xf32> to vector<32x32xf32>
    %c0_44 = arith.constant 0 : index
    %c0_45 = arith.constant 0 : index
    %129 = vector.load %arg4[%c0_44, %c0_45] : memref<32x32xf32, #tpu.memory_space<vmem>>, vector<32x32xf32>
    %cst_46 = arith.constant dense<0.000000e+00> : vector<32x32xf32>
    %130 = tpu.matmul %128, %129, %cst_46 {dimension_numbers = #tpu.dot_dimension_numbers<[1], [0], [0], [1], [0, 0, 1, 1], [], []>} : vector<32x32xf32>, vector<32x32xf32>, vector<32x32xf32> -> vector<32x32xf32>
    %c0_47 = arith.constant 0 : index
    %c0_48 = arith.constant 0 : index
    %131 = vector.load %arg9[%c0_47, %c0_48] : memref<6x32xf32, #tpu.memory_space<vmem>>, vector<1x32xf32>
    %132 = vector.broadcast %131 : vector<1x32xf32> to vector<32x32xf32>
    %133 = arith.addf %130, %132 : vector<32x32xf32>
    %134 = tpu.iota {dimensions = array<i32: 0>} : vector<32x1xi32>
    %c16_i32_49 = arith.constant 16 : i32
    %c0_i32_50 = arith.constant 0 : i32
    %135 = arith.cmpi eq, %c16_i32_49, %c0_i32_50 : i32
    %c1_i32 = arith.constant 1 : i32
    %136 = arith.select %135, %c1_i32, %c16_i32_49 : i32
    %137 = vector.broadcast %136 : i32 to vector<32x1xi32>
    %138 = arith.remsi %134, %137 : vector<32x1xi32>
    %c0_i32_51 = arith.constant 0 : i32
    %139 = vector.broadcast %c0_i32_51 : i32 to vector<32x1xi32>
    %140 = arith.cmpi ne, %138, %139 : vector<32x1xi32>
    %c0_i32_52 = arith.constant 0 : i32
    %141 = vector.broadcast %c0_i32_52 : i32 to vector<32x1xi32>
    %142 = arith.cmpi slt, %138, %141 : vector<32x1xi32>
    %c0_i32_53 = arith.constant 0 : i32
    %143 = arith.cmpi slt, %136, %c0_i32_53 : i32
    %144 = vector.broadcast %143 : i1 to vector<32x1xi1>
    %145 = vector.broadcast %144 : vector<32x1xi1> to vector<32x1xi1>
    %146 = arith.xori %142, %145 : vector<32x1xi1>
    %147 = arith.andi %146, %140 : vector<32x1xi1>
    %148 = vector.broadcast %136 : i32 to vector<32x1xi32>
    %149 = arith.addi %138, %148 : vector<32x1xi32>
    %150 = arith.select %147, %149, %138 : vector<32x1xi1>, vector<32x1xi32>
    %c3 = arith.constant 3 : index
    %c0_54 = arith.constant 0 : index
    %151 = vector.load %arg5[%c3, %c0_54] : memref<7x32xf32, #tpu.memory_space<vmem>>, vector<1x32xf32>
    %152 = vector.broadcast %151 : vector<1x32xf32> to vector<32x32xf32>
    %153 = arith.mulf %0, %152 : vector<32x32xf32>
    %c3_i32 = arith.constant 3 : i32
    %154 = tpu.dynamic_rotate %0 by %c3_i32 dim 0 : vector<32x32xf32>, i32 -> vector<32x32xf32>
    %c-3_i32 = arith.constant -3 : i32
    %155 = vector.broadcast %c-3_i32 : i32 to vector<32x1xi32>
    %156 = arith.addi %150, %155 : vector<32x1xi32>
    %c0_i32_55 = arith.constant 0 : i32
    %157 = vector.broadcast %c0_i32_55 : i32 to vector<32x1xi32>
    %158 = arith.cmpi sge, %156, %157 : vector<32x1xi32>
    %c-3_i32_56 = arith.constant -3 : i32
    %159 = vector.broadcast %c-3_i32_56 : i32 to vector<32x1xi32>
    %160 = arith.addi %150, %159 : vector<32x1xi32>
    %c16_i32_57 = arith.constant 16 : i32
    %161 = vector.broadcast %c16_i32_57 : i32 to vector<32x1xi32>
    %162 = arith.cmpi slt, %160, %161 : vector<32x1xi32>
    %163 = arith.andi %158, %162 : vector<32x1xi1>
    %cst_58 = arith.constant 0.000000e+00 : f32
    %164 = vector.shape_cast %163 : vector<32x1xi1> to vector<32x1xi1>
    %165 = vector.broadcast %164 : vector<32x1xi1> to vector<32x32xi1>
    %166 = vector.broadcast %cst_58 : f32 to vector<32x32xf32>
    %167 = arith.select %165, %154, %166 : vector<32x32xi1>, vector<32x32xf32>
    %c0_59 = arith.constant 0 : index
    %c0_60 = arith.constant 0 : index
    %168 = vector.load %arg5[%c0_59, %c0_60] : memref<7x32xf32, #tpu.memory_space<vmem>>, vector<1x32xf32>
    %169 = vector.broadcast %168 : vector<1x32xf32> to vector<32x32xf32>
    %170 = arith.mulf %167, %169 : vector<32x32xf32>
    %171 = arith.addf %153, %170 : vector<32x32xf32>
    %c2_i32 = arith.constant 2 : i32
    %172 = tpu.dynamic_rotate %0 by %c2_i32 dim 0 : vector<32x32xf32>, i32 -> vector<32x32xf32>
    %c-2_i32 = arith.constant -2 : i32
    %173 = vector.broadcast %c-2_i32 : i32 to vector<32x1xi32>
    %174 = arith.addi %150, %173 : vector<32x1xi32>
    %c0_i32_61 = arith.constant 0 : i32
    %175 = vector.broadcast %c0_i32_61 : i32 to vector<32x1xi32>
    %176 = arith.cmpi sge, %174, %175 : vector<32x1xi32>
    %c-2_i32_62 = arith.constant -2 : i32
    %177 = vector.broadcast %c-2_i32_62 : i32 to vector<32x1xi32>
    %178 = arith.addi %150, %177 : vector<32x1xi32>
    %c16_i32_63 = arith.constant 16 : i32
    %179 = vector.broadcast %c16_i32_63 : i32 to vector<32x1xi32>
    %180 = arith.cmpi slt, %178, %179 : vector<32x1xi32>
    %181 = arith.andi %176, %180 : vector<32x1xi1>
    %cst_64 = arith.constant 0.000000e+00 : f32
    %182 = vector.shape_cast %181 : vector<32x1xi1> to vector<32x1xi1>
    %183 = vector.broadcast %182 : vector<32x1xi1> to vector<32x32xi1>
    %184 = vector.broadcast %cst_64 : f32 to vector<32x32xf32>
    %185 = arith.select %183, %172, %184 : vector<32x32xi1>, vector<32x32xf32>
    %c1_65 = arith.constant 1 : index
    %c0_66 = arith.constant 0 : index
    %186 = vector.load %arg5[%c1_65, %c0_66] : memref<7x32xf32, #tpu.memory_space<vmem>>, vector<1x32xf32>
    %187 = vector.broadcast %186 : vector<1x32xf32> to vector<32x32xf32>
    %188 = arith.mulf %185, %187 : vector<32x32xf32>
    %189 = arith.addf %171, %188 : vector<32x32xf32>
    %c1_i32_67 = arith.constant 1 : i32
    %190 = tpu.dynamic_rotate %0 by %c1_i32_67 dim 0 : vector<32x32xf32>, i32 -> vector<32x32xf32>
    %c-1_i32 = arith.constant -1 : i32
    %191 = vector.broadcast %c-1_i32 : i32 to vector<32x1xi32>
    %192 = arith.addi %150, %191 : vector<32x1xi32>
    %c0_i32_68 = arith.constant 0 : i32
    %193 = vector.broadcast %c0_i32_68 : i32 to vector<32x1xi32>
    %194 = arith.cmpi sge, %192, %193 : vector<32x1xi32>
    %c-1_i32_69 = arith.constant -1 : i32
    %195 = vector.broadcast %c-1_i32_69 : i32 to vector<32x1xi32>
    %196 = arith.addi %150, %195 : vector<32x1xi32>
    %c16_i32_70 = arith.constant 16 : i32
    %197 = vector.broadcast %c16_i32_70 : i32 to vector<32x1xi32>
    %198 = arith.cmpi slt, %196, %197 : vector<32x1xi32>
    %199 = arith.andi %194, %198 : vector<32x1xi1>
    %cst_71 = arith.constant 0.000000e+00 : f32
    %200 = vector.shape_cast %199 : vector<32x1xi1> to vector<32x1xi1>
    %201 = vector.broadcast %200 : vector<32x1xi1> to vector<32x32xi1>
    %202 = vector.broadcast %cst_71 : f32 to vector<32x32xf32>
    %203 = arith.select %201, %190, %202 : vector<32x32xi1>, vector<32x32xf32>
    %c2_72 = arith.constant 2 : index
    %c0_73 = arith.constant 0 : index
    %204 = vector.load %arg5[%c2_72, %c0_73] : memref<7x32xf32, #tpu.memory_space<vmem>>, vector<1x32xf32>
    %205 = vector.broadcast %204 : vector<1x32xf32> to vector<32x32xf32>
    %206 = arith.mulf %203, %205 : vector<32x32xf32>
    %207 = arith.addf %189, %206 : vector<32x32xf32>
    %c31_i32 = arith.constant 31 : i32
    %208 = tpu.dynamic_rotate %0 by %c31_i32 dim 0 : vector<32x32xf32>, i32 -> vector<32x32xf32>
    %c1_i32_74 = arith.constant 1 : i32
    %209 = vector.broadcast %c1_i32_74 : i32 to vector<32x1xi32>
    %210 = arith.addi %150, %209 : vector<32x1xi32>
    %c0_i32_75 = arith.constant 0 : i32
    %211 = vector.broadcast %c0_i32_75 : i32 to vector<32x1xi32>
    %212 = arith.cmpi sge, %210, %211 : vector<32x1xi32>
    %c1_i32_76 = arith.constant 1 : i32
    %213 = vector.broadcast %c1_i32_76 : i32 to vector<32x1xi32>
    %214 = arith.addi %150, %213 : vector<32x1xi32>
    %c16_i32_77 = arith.constant 16 : i32
    %215 = vector.broadcast %c16_i32_77 : i32 to vector<32x1xi32>
    %216 = arith.cmpi slt, %214, %215 : vector<32x1xi32>
    %217 = arith.andi %212, %216 : vector<32x1xi1>
    %cst_78 = arith.constant 0.000000e+00 : f32
    %218 = vector.shape_cast %217 : vector<32x1xi1> to vector<32x1xi1>
    %219 = vector.broadcast %218 : vector<32x1xi1> to vector<32x32xi1>
    %220 = vector.broadcast %cst_78 : f32 to vector<32x32xf32>
    %221 = arith.select %219, %208, %220 : vector<32x32xi1>, vector<32x32xf32>
    %c4 = arith.constant 4 : index
    %c0_79 = arith.constant 0 : index
    %222 = vector.load %arg5[%c4, %c0_79] : memref<7x32xf32, #tpu.memory_space<vmem>>, vector<1x32xf32>
    %223 = vector.broadcast %222 : vector<1x32xf32> to vector<32x32xf32>
    %224 = arith.mulf %221, %223 : vector<32x32xf32>
    %225 = arith.addf %207, %224 : vector<32x32xf32>
    %c30_i32 = arith.constant 30 : i32
    %226 = tpu.dynamic_rotate %0 by %c30_i32 dim 0 : vector<32x32xf32>, i32 -> vector<32x32xf32>
    %c2_i32_80 = arith.constant 2 : i32
    %227 = vector.broadcast %c2_i32_80 : i32 to vector<32x1xi32>
    %228 = arith.addi %150, %227 : vector<32x1xi32>
    %c0_i32_81 = arith.constant 0 : i32
    %229 = vector.broadcast %c0_i32_81 : i32 to vector<32x1xi32>
    %230 = arith.cmpi sge, %228, %229 : vector<32x1xi32>
    %c2_i32_82 = arith.constant 2 : i32
    %231 = vector.broadcast %c2_i32_82 : i32 to vector<32x1xi32>
    %232 = arith.addi %150, %231 : vector<32x1xi32>
    %c16_i32_83 = arith.constant 16 : i32
    %233 = vector.broadcast %c16_i32_83 : i32 to vector<32x1xi32>
    %234 = arith.cmpi slt, %232, %233 : vector<32x1xi32>
    %235 = arith.andi %230, %234 : vector<32x1xi1>
    %cst_84 = arith.constant 0.000000e+00 : f32
    %236 = vector.shape_cast %235 : vector<32x1xi1> to vector<32x1xi1>
    %237 = vector.broadcast %236 : vector<32x1xi1> to vector<32x32xi1>
    %238 = vector.broadcast %cst_84 : f32 to vector<32x32xf32>
    %239 = arith.select %237, %226, %238 : vector<32x32xi1>, vector<32x32xf32>
    %c5 = arith.constant 5 : index
    %c0_85 = arith.constant 0 : index
    %240 = vector.load %arg5[%c5, %c0_85] : memref<7x32xf32, #tpu.memory_space<vmem>>, vector<1x32xf32>
    %241 = vector.broadcast %240 : vector<1x32xf32> to vector<32x32xf32>
    %242 = arith.mulf %239, %241 : vector<32x32xf32>
    %243 = arith.addf %225, %242 : vector<32x32xf32>
    %c29_i32 = arith.constant 29 : i32
    %244 = tpu.dynamic_rotate %0 by %c29_i32 dim 0 : vector<32x32xf32>, i32 -> vector<32x32xf32>
    %c3_i32_86 = arith.constant 3 : i32
    %245 = vector.broadcast %c3_i32_86 : i32 to vector<32x1xi32>
    %246 = arith.addi %150, %245 : vector<32x1xi32>
    %c0_i32_87 = arith.constant 0 : i32
    %247 = vector.broadcast %c0_i32_87 : i32 to vector<32x1xi32>
    %248 = arith.cmpi sge, %246, %247 : vector<32x1xi32>
    %c3_i32_88 = arith.constant 3 : i32
    %249 = vector.broadcast %c3_i32_88 : i32 to vector<32x1xi32>
    %250 = arith.addi %150, %249 : vector<32x1xi32>
    %c16_i32_89 = arith.constant 16 : i32
    %251 = vector.broadcast %c16_i32_89 : i32 to vector<32x1xi32>
    %252 = arith.cmpi slt, %250, %251 : vector<32x1xi32>
    %253 = arith.andi %248, %252 : vector<32x1xi1>
    %cst_90 = arith.constant 0.000000e+00 : f32
    %254 = vector.shape_cast %253 : vector<32x1xi1> to vector<32x1xi1>
    %255 = vector.broadcast %254 : vector<32x1xi1> to vector<32x32xi1>
    %256 = vector.broadcast %cst_90 : f32 to vector<32x32xf32>
    %257 = arith.select %255, %244, %256 : vector<32x32xi1>, vector<32x32xf32>
    %c6 = arith.constant 6 : index
    %c0_91 = arith.constant 0 : index
    %258 = vector.load %arg5[%c6, %c0_91] : memref<7x32xf32, #tpu.memory_space<vmem>>, vector<1x32xf32>
    %259 = vector.broadcast %258 : vector<1x32xf32> to vector<32x32xf32>
    %260 = arith.mulf %257, %259 : vector<32x32xf32>
    %261 = arith.addf %243, %260 : vector<32x32xf32>
    %c1_92 = arith.constant 1 : index
    %c0_93 = arith.constant 0 : index
    %262 = vector.load %arg9[%c1_92, %c0_93] : memref<6x32xf32, #tpu.memory_space<vmem>>, vector<1x32xf32>
    %263 = vector.broadcast %262 : vector<1x32xf32> to vector<32x32xf32>
    %264 = arith.addf %261, %263 : vector<32x32xf32>
    %cst_94 = arith.constant 0.000000e+00 : f32
    %265 = vector.broadcast %cst_94 : f32 to vector<32x32xf32>
    %266 = arith.maximumf %264, %265 : vector<32x32xf32>
    %c0_95 = arith.constant 0 : index
    %c0_96 = arith.constant 0 : index
    %267 = vector.load %arg6[%c0_95, %c0_96] : memref<32x32xf32, #tpu.memory_space<vmem>>, vector<32x32xf32>
    %cst_97 = arith.constant dense<0.000000e+00> : vector<32x32xf32>
    %268 = tpu.matmul %266, %267, %cst_97 {dimension_numbers = #tpu.dot_dimension_numbers<[1], [0], [0], [1], [0, 0, 1, 1], [], []>} : vector<32x32xf32>, vector<32x32xf32>, vector<32x32xf32> -> vector<32x32xf32>
    %c2_98 = arith.constant 2 : index
    %c0_99 = arith.constant 0 : index
    %269 = vector.load %arg9[%c2_98, %c0_99] : memref<6x32xf32, #tpu.memory_space<vmem>>, vector<1x32xf32>
    %270 = vector.broadcast %269 : vector<1x32xf32> to vector<32x32xf32>
    %271 = arith.addf %268, %270 : vector<32x32xf32>
    %cst_100 = arith.constant 0.000000e+00 : f32
    %272 = vector.broadcast %cst_100 : f32 to vector<32x32xf32>
    %273 = arith.maximumf %271, %272 : vector<32x32xf32>
    %c0_101 = arith.constant 0 : index
    %c0_102 = arith.constant 0 : index
    %274 = vector.load %arg7[%c0_101, %c0_102] : memref<64x64xf32, #tpu.memory_space<vmem>>, vector<64x64xf32>
    %275 = vector.extract_strided_slice %274 {offsets = [0, 0], sizes = [32, 64], strides = [1, 1]} : vector<64x64xf32> to vector<32x64xf32>
    %cst_103 = arith.constant dense<0.000000e+00> : vector<32x64xf32>
    %276 = tpu.matmul %133, %275, %cst_103 {dimension_numbers = #tpu.dot_dimension_numbers<[1], [0], [0], [1], [0, 0, 1, 1], [], []>} : vector<32x32xf32>, vector<32x64xf32>, vector<32x64xf32> -> vector<32x64xf32>
    %277 = vector.extract_strided_slice %274 {offsets = [32, 0], sizes = [32, 64], strides = [1, 1]} : vector<64x64xf32> to vector<32x64xf32>
    %cst_104 = arith.constant dense<0.000000e+00> : vector<32x64xf32>
    %278 = tpu.matmul %273, %277, %cst_104 {dimension_numbers = #tpu.dot_dimension_numbers<[1], [0], [0], [1], [0, 0, 1, 1], [], []>} : vector<32x32xf32>, vector<32x64xf32>, vector<32x64xf32> -> vector<32x64xf32>
    %279 = arith.addf %276, %278 : vector<32x64xf32>
    %c0_105 = arith.constant 0 : index
    %c0_106 = arith.constant 0 : index
    %280 = vector.load %arg10[%c0_105, %c0_106] : memref<3x64xf32, #tpu.memory_space<vmem>>, vector<1x64xf32>
    %281 = vector.broadcast %280 : vector<1x64xf32> to vector<32x64xf32>
    %282 = arith.addf %279, %281 : vector<32x64xf32>
    %cst_107 = arith.constant dense<0.000000e+00> : vector<32xf32>
    %283 = vector.multi_reduction <add>, %282, %cst_107 [1] : vector<32x64xf32> to vector<32xf32>
    %284 = vector.shape_cast %283 : vector<32xf32> to vector<32x1xf32>
    %cst_108 = arith.constant 6.400000e+01 : f32
    %285 = vector.broadcast %cst_108 : f32 to vector<32x1xf32>
    %286 = arith.divf %284, %285 : vector<32x1xf32>
    %287 = vector.broadcast %286 : vector<32x1xf32> to vector<32x64xf32>
    %288 = arith.subf %282, %287 : vector<32x64xf32>
    %289 = arith.mulf %288, %288 : vector<32x64xf32>
    %cst_109 = arith.constant dense<0.000000e+00> : vector<32xf32>
    %290 = vector.multi_reduction <add>, %289, %cst_109 [1] : vector<32x64xf32> to vector<32xf32>
    %291 = vector.shape_cast %290 : vector<32xf32> to vector<32x1xf32>
    %cst_110 = arith.constant 6.400000e+01 : f32
    %292 = vector.broadcast %cst_110 : f32 to vector<32x1xf32>
    %293 = arith.divf %291, %292 : vector<32x1xf32>
    %294 = vector.broadcast %286 : vector<32x1xf32> to vector<32x64xf32>
    %295 = arith.subf %282, %294 : vector<32x64xf32>
    %cst_111 = arith.constant 9.99999974E-6 : f32
    %296 = vector.broadcast %cst_111 : f32 to vector<32x1xf32>
    %297 = arith.addf %293, %296 : vector<32x1xf32>
    %298 = math.rsqrt %297 : vector<32x1xf32>
    %299 = vector.broadcast %298 : vector<32x1xf32> to vector<32x64xf32>
    %300 = arith.mulf %295, %299 : vector<32x64xf32>
    %c1_112 = arith.constant 1 : index
    %c0_113 = arith.constant 0 : index
    %301 = vector.load %arg10[%c1_112, %c0_113] : memref<3x64xf32, #tpu.memory_space<vmem>>, vector<1x64xf32>
    %302 = vector.broadcast %301 : vector<1x64xf32> to vector<32x64xf32>
    %303 = arith.mulf %300, %302 : vector<32x64xf32>
    %c2_114 = arith.constant 2 : index
    %c0_115 = arith.constant 0 : index
    %304 = vector.load %arg10[%c2_114, %c0_115] : memref<3x64xf32, #tpu.memory_space<vmem>>, vector<1x64xf32>
    %305 = vector.broadcast %304 : vector<1x64xf32> to vector<32x64xf32>
    %306 = arith.addf %303, %305 : vector<32x64xf32>
    %cst_116 = arith.constant 0.000000e+00 : f32
    %307 = vector.broadcast %cst_116 : f32 to vector<32x64xf32>
    %308 = arith.maximumf %306, %307 : vector<32x64xf32>
    %c0_117 = arith.constant 0 : index
    %c0_118 = arith.constant 0 : index
    %309 = vector.load %arg8[%c0_117, %c0_118] : memref<64x32xf32, #tpu.memory_space<vmem>>, vector<64x32xf32>
    %cst_119 = arith.constant dense<0.000000e+00> : vector<32x32xf32>
    %310 = tpu.matmul %308, %309, %cst_119 {dimension_numbers = #tpu.dot_dimension_numbers<[1], [0], [0], [1], [0, 0, 1, 1], [], []>} : vector<32x64xf32>, vector<64x32xf32>, vector<32x32xf32> -> vector<32x32xf32>
    %c3_120 = arith.constant 3 : index
    %c0_121 = arith.constant 0 : index
    %311 = vector.load %arg9[%c3_120, %c0_121] : memref<6x32xf32, #tpu.memory_space<vmem>>, vector<1x32xf32>
    %312 = vector.broadcast %311 : vector<1x32xf32> to vector<32x32xf32>
    %313 = arith.addf %310, %312 : vector<32x32xf32>
    %314 = arith.addf %0, %313 : vector<32x32xf32>
    %cst_122 = arith.constant dense<0.000000e+00> : vector<32xf32>
    %315 = vector.multi_reduction <add>, %314, %cst_122 [1] : vector<32x32xf32> to vector<32xf32>
    %316 = vector.shape_cast %315 : vector<32xf32> to vector<32x1xf32>
    %cst_123 = arith.constant 3.200000e+01 : f32
    %317 = vector.broadcast %cst_123 : f32 to vector<32x1xf32>
    %318 = arith.divf %316, %317 : vector<32x1xf32>
    %319 = vector.broadcast %318 : vector<32x1xf32> to vector<32x32xf32>
    %320 = arith.subf %314, %319 : vector<32x32xf32>
    %321 = arith.mulf %320, %320 : vector<32x32xf32>
    %cst_124 = arith.constant dense<0.000000e+00> : vector<32xf32>
    %322 = vector.multi_reduction <add>, %321, %cst_124 [1] : vector<32x32xf32> to vector<32xf32>
    %323 = vector.shape_cast %322 : vector<32xf32> to vector<32x1xf32>
    %cst_125 = arith.constant 3.200000e+01 : f32
    %324 = vector.broadcast %cst_125 : f32 to vector<32x1xf32>
    %325 = arith.divf %323, %324 : vector<32x1xf32>
    %326 = vector.broadcast %318 : vector<32x1xf32> to vector<32x32xf32>
    %327 = arith.subf %314, %326 : vector<32x32xf32>
    %cst_126 = arith.constant 9.99999974E-6 : f32
    %328 = vector.broadcast %cst_126 : f32 to vector<32x1xf32>
    %329 = arith.addf %325, %328 : vector<32x1xf32>
    %330 = math.rsqrt %329 : vector<32x1xf32>
    %331 = vector.broadcast %330 : vector<32x1xf32> to vector<32x32xf32>
    %332 = arith.mulf %327, %331 : vector<32x32xf32>
    %c4_127 = arith.constant 4 : index
    %c0_128 = arith.constant 0 : index
    %333 = vector.load %arg9[%c4_127, %c0_128] : memref<6x32xf32, #tpu.memory_space<vmem>>, vector<1x32xf32>
    %334 = vector.broadcast %333 : vector<1x32xf32> to vector<32x32xf32>
    %335 = arith.mulf %332, %334 : vector<32x32xf32>
    %c5_129 = arith.constant 5 : index
    %c0_130 = arith.constant 0 : index
    %336 = vector.load %arg9[%c5_129, %c0_130] : memref<6x32xf32, #tpu.memory_space<vmem>>, vector<1x32xf32>
    %337 = vector.broadcast %336 : vector<1x32xf32> to vector<32x32xf32>
    %338 = arith.addf %335, %337 : vector<32x32xf32>
    %c0_131 = arith.constant 0 : index
    %c0_132 = arith.constant 0 : index
    %339 = vector.load %arg11[%c0_131, %c0_132] : memref<32x32xf32, #tpu.memory_space<vmem>>, vector<32x32xf32>
    tpu.vector_store %arg11[%c0_131, %c0_132], %338 {strides = array<i32>} : memref<32x32xf32, #tpu.memory_space<vmem>>, vector<32x32xf32>,
    return
  }
  func.func @transform_0(%arg0: i32) -> (i32, i32) {
    %c0_i32 = arith.constant 0 : i32
    %c0_i32_0 = arith.constant 0 : i32
    return %arg0, %c0_i32 : i32, i32
  }
  func.func @transform_1(%arg0: i32) -> (i32, i32, i32) {
    %c0_i32 = arith.constant 0 : i32
    %c0_i32_0 = arith.constant 0 : i32
    %c0_i32_1 = arith.constant 0 : i32
    %c0_i32_2 = arith.constant 0 : i32
    return %c0_i32, %c0_i32_0, %c0_i32_1 : i32, i32, i32
  }
  func.func @transform_2(%arg0: i32) -> (i32, i32) {
    %c0_i32 = arith.constant 0 : i32
    %c0_i32_0 = arith.constant 0 : i32
    %c0_i32_1 = arith.constant 0 : i32
    return %c0_i32, %c0_i32_0 : i32, i32
  }
  func.func @transform_3(%arg0: i32) -> (i32, i32) {
    %c0_i32 = arith.constant 0 : i32
    %c0_i32_0 = arith.constant 0 : i32
    %c0_i32_1 = arith.constant 0 : i32
    return %c0_i32, %c0_i32_0 : i32, i32
  }
  func.func @transform_4(%arg0: i32) -> (i32, i32) {
    %c0_i32 = arith.constant 0 : i32
    %c0_i32_0 = arith.constant 0 : i32
    %c0_i32_1 = arith.constant 0 : i32
    return %c0_i32, %c0_i32_0 : i32, i32
  }
  func.func @transform_5(%arg0: i32) -> (i32, i32) {
    %c0_i32 = arith.constant 0 : i32
    %c0_i32_0 = arith.constant 0 : i32
    %c0_i32_1 = arith.constant 0 : i32
    return %c0_i32, %c0_i32_0 : i32, i32
  }
  func.func @transform_6(%arg0: i32) -> (i32, i32) {
    %c0_i32 = arith.constant 0 : i32
    %c0_i32_0 = arith.constant 0 : i32
    %c0_i32_1 = arith.constant 0 : i32
    return %c0_i32, %c0_i32_0 : i32, i32
  }
  func.func @transform_7(%arg0: i32) -> (i32, i32) {
    %c0_i32 = arith.constant 0 : i32
    %c0_i32_0 = arith.constant 0 : i32
    %c0_i32_1 = arith.constant 0 : i32
    return %c0_i32, %c0_i32_0 : i32, i32
  }
  func.func @transform_8(%arg0: i32) -> (i32, i32) {
    %c0_i32 = arith.constant 0 : i32
    %c0_i32_0 = arith.constant 0 : i32
    %c0_i32_1 = arith.constant 0 : i32
    return %c0_i32, %c0_i32_0 : i32, i32
  }
  func.func @transform_9(%arg0: i32) -> (i32, i32) {
    %c0_i32 = arith.constant 0 : i32
    %c0_i32_0 = arith.constant 0 : i32
    %c0_i32_1 = arith.constant 0 : i32
    return %c0_i32, %c0_i32_0 : i32, i32
  }
  func.func @transform_10(%arg0: i32) -> (i32, i32) {
    %c0_i32 = arith.constant 0 : i32
    %c0_i32_0 = arith.constant 0 : i32
    return %arg0, %c0_i32 : i32, i32
  }
}

</mosaic_0001>

<bundles_post_ra>
// kernel: tpu_custom_call.1
= control target key start
LH: loop header
LB: loop body
LE: loop exit
PB: predicated region body
PF: predicated region fallthrough
CT: control target
= control target key end

     0   :  { %15 = vsyncpa [#allocation3], 0  ;;  %s4750_s0 = inlined_call_operand.hbm [shape: f32[32,32], index: 0, kind: input, shape index: {}]   ;;  %s4751_s1 = inlined_call_operand.vmem [shape: f32[3,32,32], index: 1, kind: input, shape index: {}]   ;;  %s4752_s2 = inlined_call_operand.hbm [shape: f32[3,32], index: 2, kind: input, shape index: {}]   ;;  %s4753_s3 = inlined_call_operand.hbm [shape: f32[32,32], index: 3, kind: input, shape index: {}]   ;;  %s4754_s4 = inlined_call_operand.vmem [shape: f32[7,32], index: 4, kind: input, shape index: {}]   ;;  %s4755_s5 = inlined_call_operand.hbm [shape: f32[32,32], index: 5, kind: input, shape index: {}]   ;;  %s4756_s6 = inlined_call_operand.hbm [shape: f32[64,64], index: 6, kind: input, shape index: {}]   ;;  %s4757_s7 = inlined_call_operand.vmem [shape: f32[64,32], index: 7, kind: input, shape index: {}]   ;;  %s4758_s8 = inlined_call_operand.vmem [shape: f32[6,32], index: 8, kind: input, shape index: {}]   ;;  %s4759_s9 = inlined_call_operand.vmem [shape: f32[3,64], index: 9, kind: input, shape index: {}]   ;;  %s4760_s10 = inlined_call_operand.hbm [shape: f32[32,32], index: 10, kind: output, shape index: {}]  }
   0x1   :  { %16 = vsyncpa [#allocation6], 0 }
   0x2   :  { %17 = vsyncpa [#allocation9], 0 }
   0x3   :  { %18 = vsyncpa [#allocation4], 0  ;;  %s3939_s13 = smov [#allocation5]   ;;  %s3799_s17 = scalar_lea.hbm %s4752_s2, 64 }
   0x4   :  { %s39_s14 = sshll.u32 %s3939_s13, 4  ;;  %p3800_p0 = scmp.ne.s32.totalorder %s4752_s2, %s3799_s17  ;;  %s40_s14 = int_to_ptr.vmem [resolvable:$true] %s39_s14 }
   0x5   :  { %p3803_p1 = scmp.lt.u32.totalorder %s3799_s17, %s4752_s2 }
   0x7   :  { %p3805_p2 = pnand %p3803_p1, %p3800_p0 }
   0x9   :  { %3808 = shalt.err (!%p3805_p2)
}
   0xa   :  { %s3809_s22 = scalar_lea.vmem %s40_s14, 64  ;;  %p3814_p4 = scmp.lt.s32.totalorder %s40_s14, %s40_s14 }
   0xb   :  { %p3810_p3 = scmp.ne.s32.totalorder %s40_s14, %s3809_s22  ;;  %p3815_p5 = scmp.lt.s32.totalorder %s3809_s22, %s3809_s22 }
   0xd   :  { %p3816_p6 = por %p3815_p5, %p3814_p4 }
   0xf   :  { %p3817_p7 = pnand %p3816_p6, %p3810_p3 }
  0x11   :  { %3820 = shalt.err (!%p3817_p7)
}
  0x12   :  { %42 = dma.hbm_to_vmem [thread:$0]  %s4752_s2, 64, %s40_s14, [#allocation6]  }
  0x13   :  { %s3940_s25 = smov [#allocation8]   ;;  %s3941_s27 = smov [#allocation2]  }
  0x14   :  { %s62_s26 = sshll.u32 %s3940_s25, 4  ;;  %s24_s28 = sshll.u32 %s3941_s27, 4  ;;  %s63_s26 = int_to_ptr.vmem [resolvable:$true] %s62_s26  ;;  %s25_s28 = int_to_ptr.vmem [resolvable:$true] %s24_s28 }
  0x15   :  { %s3821_s11 = scalar_lea.hbm %s4755_s5, 512 }
  0x16   :  { %p3822_p8 = scmp.ne.s32.totalorder %s4755_s5, %s3821_s11  ;;  %p3825_p9 = scmp.lt.u32.totalorder %s3821_s11, %s4755_s5 }
  0x18   :  { %p3827_p10 = pnand %p3825_p9, %p3822_p8 }
  0x1a   :  { %3830 = shalt.err (!%p3827_p10)
}
  0x1b   :  { %s3831_s2 = scalar_lea.vmem %s63_s26, 512  ;;  %p3836_p12 = scmp.lt.s32.totalorder %s63_s26, %s63_s26 }
  0x1c   :  { %p3832_p11 = scmp.ne.s32.totalorder %s63_s26, %s3831_s2  ;;  %p3837_p13 = scmp.lt.s32.totalorder %s3831_s2, %s3831_s2 }
  0x1e   :  { %p3838_p0 = por %p3837_p13, %p3836_p12 }
  0x20   :  { %p3839_p1 = pnand %p3838_p0, %p3832_p11 }
  0x22   :  { %3842 = shalt.err (!%p3839_p1)
}
  0x23   :  { %s3942_s14 = smov 128   ;;  %s3943_s17 = smov 8  }
  0x24   :  { %68 = dma.hbm_to_vmem [thread:$0]  %s4755_s5, 512, %s63_s26, [#allocation9], %s3942_s14, %s3942_s14, %s3943_s17  }
  0x25   :  { %s3843_s22 = scalar_lea.hbm %s4750_s0, 512 }
  0x26   :  { %p3844_p2 = scmp.ne.s32.totalorder %s4750_s0, %s3843_s22  ;;  %p3847_p3 = scmp.lt.u32.totalorder %s3843_s22, %s4750_s0 }
  0x28   :  { %p3849_p4 = pnand %p3847_p3, %p3844_p2 }
  0x2a   :  { %3852 = shalt.err (!%p3849_p4)
}
  0x2b   :  { %s3853_s29 = scalar_lea.vmem %s25_s28, 512  ;;  %p3858_p6 = scmp.lt.s32.totalorder %s25_s28, %s25_s28 }
  0x2c   :  { %p3854_p5 = scmp.ne.s32.totalorder %s25_s28, %s3853_s29  ;;  %p3859_p7 = scmp.lt.s32.totalorder %s3853_s29, %s3853_s29 }
  0x2e   :  { %p3860_p8 = por %p3859_p7, %p3858_p6 }
  0x30   :  { %p3861_p9 = pnand %p3860_p8, %p3854_p5 }
  0x32   :  { %3864 = shalt.err (!%p3861_p9)
}
  0x33   :  { %30 = dma.hbm_to_vmem [thread:$0]  %s4750_s0, 512, %s25_s28, [#allocation3], %s3942_s14, %s3942_s14, %s3943_s17  }
  0x34   :  { %s3944_s30 = smov [#allocation7]   ;;  %s3945_s12 = smov [#allocation10]  }
  0x35   :  { %s48_s11 = sshll.u32 %s3944_s30, 4  ;;  %s74_s13 = sshll.u32 %s3945_s12, 4  ;;  %s49_s11 = int_to_ptr.vmem [resolvable:$true] %s48_s11  ;;  %s75_s13 = int_to_ptr.vmem [resolvable:$true] %s74_s13 }
  0x36   :  { %s3865_s2 = scalar_lea.hbm %s4753_s3, 512 }
  0x37   :  { %p3866_p10 = scmp.ne.s32.totalorder %s4753_s3, %s3865_s2  ;;  %p3869_p11 = scmp.lt.u32.totalorder %s3865_s2, %s4753_s3 }
  0x39   :  { %p3871_p12 = pnand %p3869_p11, %p3866_p10 }
  0x3b   :  { %3874 = shalt.err (!%p3871_p12)
}
  0x3c   :  { %s3875_s0 = scalar_lea.vmem %s49_s11, 512  ;;  %p3880_p0 = scmp.lt.s32.totalorder %s49_s11, %s49_s11 }
  0x3d   :  { %p3876_p13 = scmp.ne.s32.totalorder %s49_s11, %s3875_s0  ;;  %p3881_p1 = scmp.lt.s32.totalorder %s3875_s0, %s3875_s0 }
  0x3f   :  { %p3882_p2 = por %p3881_p1, %p3880_p0 }
  0x41   :  { %p3883_p3 = pnand %p3882_p2, %p3876_p13 }
  0x43   :  { %3886 = shalt.err (!%p3883_p3)
}
  0x44   :  { %54 = dma.hbm_to_vmem [thread:$0]  %s4753_s3, 512, %s49_s11, [#allocation6], %s3942_s14, %s3942_s14, %s3943_s17  }
  0x45   :  { %s3887_s25 = scalar_lea.hbm %s4756_s6, 1024 }
  0x46   :  { %p3888_p4 = scmp.ne.s32.totalorder %s4756_s6, %s3887_s25  ;;  %p3891_p5 = scmp.lt.u32.totalorder %s3887_s25, %s4756_s6 }
  0x48   :  { %p3893_p6 = pnand %p3891_p5, %p3888_p4 }
  0x4a   :  { %3896 = shalt.err (!%p3893_p6)
}
  0x4b   :  { %s3897_s30 = scalar_lea.vmem %s75_s13, 1024  ;;  %p3902_p8 = scmp.lt.s32.totalorder %s75_s13, %s75_s13 }
  0x4c   :  { %p3898_p7 = scmp.ne.s32.totalorder %s75_s13, %s3897_s30  ;;  %p3903_p9 = scmp.lt.s32.totalorder %s3897_s30, %s3897_s30 }
  0x4e   :  { %p3904_p10 = por %p3903_p9, %p3902_p8 }
  0x50   :  { %p3905_p11 = pnand %p3904_p10, %p3898_p7 }
  0x52   :  { %3908 = shalt.err (!%p3905_p11)
}
  0x53   :  { %80 = dma.hbm_to_vmem [thread:$0]  %s4756_s6, 1024, %s75_s13, [#allocation9], %s3942_s14, %s3942_s14, %s3943_s17  }
  0x54   :  { %3931 = dma.done.wait [#allocation3], 512  }
  0x55   :  { %3932 = vsyncadd [#allocation3], 4294966784 }
  0x56   :  { %3933 = dma.done.wait [#allocation6], 576  }
  0x57   :  { %3934 = vsyncadd [#allocation6], 4294966720 }
  0x58   :  { %3935 = dma.done.wait [#allocation9], 1536  }
  0x59   :  { %3936 = vsyncadd [#allocation9], 4294965760  ;;  %vm115_vm0 = vcmask 261120   ;;  %v3041_v0 = vld [vmem:[%s4751_s1 + $0x20] sm:$0xff]  ;;  %v3042_v1 = vld [vmem:[%s4751_s1 + $0x28] sm:$0xff]  ;;  %v403_v22 = vlaneseq  ;;  %vm588_vm13 = vcmask 130048  }
  0x5a   :  { %v3043_v2 = vld [vmem:[%s4751_s1 + $0x30] sm:$0xff]  ;;  %v3531_v3 = vpack.c.bf16 %v3042_v1, %v3041_v0  ;;  %v3044_v4 = vld [vmem:[%s4751_s1 + $0x38] sm:$0xff]  ;;  %v4086_v5 = vld [vmem:[#allocation2] sm:$0xff]  ;;  %s3946_s30 = smov [#allocation11]  }
  0x5b   :  { %v106_v6 = vld [vmem:[%s4751_s1] sm:$0xff]  ;;  %v3535_v7 = vpack.c.bf16 %v3044_v4, %v3043_v2  ;;  %3313 = vmatprep.mubr.msk.f32.mxu1 %vm115_vm0, %v4086_v5  ;;  %v107_v8 = vld [vmem:[%s4751_s1 + $0x8] sm:$0xff]  ;;  %3299 = vmatprep.mubr.msk.f32.mxu0 %vm115_vm0, %v4086_v5  ;;  %v108_v10 = vld [vmem:[%s4751_s1 + $0x10] sm:$0xff]  ;;  %v4143_v24 = vand.u32 127, %v403_v22  ;;  %s3022_s3 = sshll.u32 %s3946_s30, 4  ;;  %s3023_s3 = int_to_ptr.vmem [resolvable:$true] %s3022_s3 }
  0x5c   :  { %3532 = vmatprep.subr.bf16.mxu1 %v3531_v3  ;;  %v3523_v9 = vpack.c.bf16 %v107_v8, %v106_v6  ;;  %v109_v11 = vld [vmem:[%s4751_s1 + $0x18] sm:$0xff]  ;;  %v3050_v13 = vld [vmem:[%s4751_s1 + $0x40] sm:$0xff]  ;;  %v3051_v14 = vld [vmem:[%s4751_s1 + $0x48] sm:$0xff]  ;;  %p3914_p13 = scmp.lt.s32.totalorder %s3023_s3, %s3023_s3 }
  0x5d   :  { %3534 = vmatpush3.bf16.msra.mxu1 %v3531_v3  ;;  %v3527_v12 = vpack.c.bf16 %v109_v11, %v108_v10  ;;  %v3539_v15 = vpack.c.bf16 %v3051_v14, %v3050_v13  ;;  %v4110_v16 = vld [vmem:[#allocation2 + $0x8] sm:$0xff]  ;;  %v4112_v17 = vld [vmem:[#allocation2 + $0x10] sm:$0xff]  ;;  %v4118_v18 = vld [vmem:[#allocation2 + $0x18] sm:$0xff]  ;;  %vm406_vm2 = vcmp.lt.s32.totalorder %v4143_v24, 8  ;;  %vm637_vm3 = vcmp.ge.s32.totalorder %v4143_v24, 8 }
  0x5e   :  { %3536 = vmatprep.subr.bf16.mxu1 %v3535_v7  ;;  %3524 = vmatprep.subr.bf16.mxu0 %v3523_v9  ;;  %v3052_v19 = vld [vmem:[%s4751_s1 + $0x50] sm:$0xff]  ;;  %v3053_v20 = vld [vmem:[%s4751_s1 + $0x58] sm:$0xff]  ;;  %v3045_v23 = vld [vmem:[#allocation5 + $0x1] ss:$0 sm:$0xff]  ;;  %vm638_vm4 = vcmp.lt.s32.totalorder %v4143_v24, 16  ;;  %vm1180_vm6 = vcmp.ge.s32.totalorder %v4143_v24, 16 }
  0x5f   :  { %3526 = vmatpush3.bf16.msra.mxu0 %v3523_v9  ;;  %v3543_v21 = vpack.c.bf16 %v3053_v20, %v3052_v19  ;;  %v3036_v28 = vld [vmem:[#allocation5] ss:$0 sm:$0xff]  ;;  %vm4147_vm1 = vmpackc.low %vm115_vm0, %vm115_vm0  ;;  %vm1181_vm7 = vcmp.lt.s32.totalorder %v4143_v24, 24  ;;  %vm1565_vm9 = vcmp.ge.s32.totalorder %v4143_v24, 24  ;;  %vm1566_vm10 = vcmp.lt.s32.totalorder %v4143_v24, 32 }
  0x60   :  { %3528 = vmatprep.subr.bf16.mxu0 %v3527_v12  ;;  %vm4180_vm5 = vmand %vm637_vm3, %vm638_vm4  ;;  %v3054_v62 = vld [vmem:[#allocation5 + $0x2] ss:$0 sm:$0xff] }
  0x61   :  { %3538 = vmatpush3.bf16.msra.mxu1 %v3535_v7  ;;  %vm4212_vm8 = vmand %vm1180_vm6, %vm1181_vm7 }
  0x62   :  { %vm4242_vm11 = vmand %vm1565_vm9, %vm1566_vm10 }
  0x63   :  { %3530 = vmatpush3.bf16.msra.mxu0 %v3527_v12  ;;  %vm4263_vm12 = vmpackc.low %vm4180_vm5, %vm4180_vm5 }
  0x64   :  { %3314 = vmatmul.mubr.msk.f32.vlgmr.msra.gmra.mrb[0].mxu1 %vm115_vm0, %v4110_v16  ;;  %3540 = vmatprep.subr.bf16.mxu0 %v3539_v15  ;;  %vm4369_vm14 = vmpackc.low %vm406_vm2, %vm406_vm2 }
  0x65   :  { %3316 = vmatprep.mubr.msk.f32.mxu1 %vm115_vm0, %v4112_v17  ;;  %vm4396_vm15 = vmpackc.low %vm4212_vm8, %vm4212_vm8 }
  0x66   :  { %3300 = vmatmul.mubr.msk.f32.vlgmr.msra.gmra.mrb[0].mxu0 %vm115_vm0, %v4110_v16 }
  0x67   :  { %3302 = vmatprep.mubr.msk.f32.mxu0 %vm115_vm0, %v4112_v17  ;;  %3542 = vmatpush3.bf16.msra.mxu0 %v3539_v15 }
  0x68   :  { %3317 = vmatmul.mubr.msk.f32.gmra.mrb[2].mxu1 %vm115_vm0, %v4118_v18  ;;  %3544 = vmatprep.subr.bf16.mxu0 %v3543_v21 }
  0x6a   :  { %3303 = vmatmul.mubr.msk.f32.gmra.mrb[2].mxu0 %vm115_vm0, %v4118_v18 }
  0x6b   :  { %3327 = vmatprep.mubr.msk.f32.mxu0 %vm115_vm0, %v4086_v5  ;;  %3546 = vmatpush3.bf16.msra.mxu0 %v3543_v21 }
  0x6e   :  { %3328 = vmatmul.mubr.msk.f32.vlgmr.msra.gmra.mrb[4].mxu0 %vm115_vm0, %v4110_v16 }
  0x6f   :  { %3330 = vmatprep.mubr.msk.f32.mxu0 %vm115_vm0, %v4112_v17 }
  0x72   :  { %3331 = vmatmul.mubr.msk.f32.gmra.mrb[6].mxu0 %vm115_vm0, %v4118_v18 }
 0x137   :  { %v3315_v25 = vpop.f32.mrb[0].mxu1 }
 0x138   :  { %v295_v26 = vadd.f32 %v3315_v25, %v3045_v23  ;;  %v289_v27 = vpop.f32.mrb[1].mxu1 }
 0x139   :  { %v290_v29 = vadd.f32 %v3045_v23, %v289_v27  ;;  %v3301_v30 = vpop.f32.mrb[0].mxu0 }
 0x13a   :  { %v194_v32 = vpop.f32.mrb[1].mxu0  ;;  %v200_v41 = vadd.f32 %v3301_v30, %v3036_v28 }
 0x13b   :  { %v3547_v33 = vpack.c.bf16 %v295_v26, %v290_v29  ;;  %v3318_v34 = vpop.f32.mrb[2].mxu1  ;;  %v195_v35 = vadd.f32 %v3036_v28, %v194_v32 }
 0x13c   :  { %v305_v36 = vadd.f32 %v3318_v34, %v3045_v23  ;;  %v299_v37 = vpop.f32.mrb[3].mxu1  ;;  %v411_v47 = vsel %vm406_vm2, %v200_v41, 0.0  ;;  %v643_v52 = vsel %vm4180_vm5, %v200_v41, 0.0  ;;  %v1186_v56 = vsel %vm4212_vm8, %v200_v41, 0.0 }
 0x13d   :  { %v300_v38 = vadd.f32 %v3045_v23, %v299_v37  ;;  %3549 = vmatprep.subr.msk.bf16.mxu1 %vm4147_vm1, %v3547_v33  ;;  %v3304_v39 = vpop.f32.mrb[2].mxu0  ;;  %v410_v40 = vsel %vm406_vm2, %v195_v35, 0.0  ;;  %v642_v49 = vsel %vm4180_vm5, %v195_v35, 0.0  ;;  %v1185_v55 = vsel %vm4212_vm8, %v195_v35, 0.0 }
 0x13e   :  { %3552 = vmatpush3.bf16.xpose.msk.msra.mxu1 %vm4147_vm1, %v3547_v33  ;;  %v204_v42 = vpop.f32.mrb[3].mxu0  ;;  %3337 = vmatprep.mubr.msk.f32.mxu1 %vm115_vm0, %v410_v40  ;;  %v4176_v46 = vadd.f32 %v3304_v39, %v3036_v28  ;;  %v1570_v60 = vsel %vm4242_vm11, %v195_v35, 0.0  ;;  %v1571_v61 = vsel %vm4242_vm11, %v200_v41, 0.0 }
 0x13f   :  { %v4159_v43 = vpack.c.bf16 %v305_v36, %v300_v38  ;;  %3561 = vmatprep.subr.msk.bf16.mxu1 %vm4147_vm1, %v3547_v33  ;;  %v4163_v44 = vadd.f32 %v3036_v28, %v204_v42 }
 0x140   :  { %v413_v50 = vsel %vm406_vm2, %v4176_v46, 0.0  ;;  %v645_v54 = vsel %vm4180_vm5, %v4176_v46, 0.0  ;;  %v1188_v59 = vsel %vm4212_vm8, %v4176_v46, 0.0 }
 0x141   :  { %3555 = vmatprep.subr.msk.bf16.mxu0 %vm4147_vm1, %v4159_v43  ;;  %v412_v45 = vsel %vm406_vm2, %v4163_v44, 0.0  ;;  %v644_v51 = vsel %vm4180_vm5, %v4163_v44, 0.0  ;;  %v1187_v57 = vsel %vm4212_vm8, %v4163_v44, 0.0  ;;  %v3329_v63 = vpop.f32.mrb[4].mxu0  ;;  %vm4437_vm2 = vmpackc.low %vm4242_vm11, %vm4242_vm11 }
 0x142   :  { %3558 = vmatpush3.bf16.xpose.msk.msra.mxu0 %vm4147_vm1, %v4159_v43  ;;  %3344 = vmatprep.mubr.msk.f32.mxu0 %vm115_vm0, %v412_v45  ;;  %v390_v0 = vadd.f32 %v3329_v63, %v3054_v62  ;;  %v384_v1 = vpop.f32.mrb[5].mxu0 }
 0x143   :  { %3567 = vmatprep.subr.msk.bf16.mxu0 %vm4147_vm1, %v4159_v43  ;;  %v385_v2 = vadd.f32 %v3054_v62, %v384_v1 }
 0x145   :  { %3338 = vmatmul.mubr.msk.f32.vlgmr.msra.gmra.mrb[4].mxu1 %vm115_vm0, %v411_v47  ;;  %v4258_v3 = vpack.c.bf16 %v390_v0, %v385_v2  ;;  %v3332_v4 = vpop.f32.mrb[6].mxu0 }
 0x146   :  { %3564 = vmatpush3.bf16.xpose.msk.msra.mxu1 %vm4147_vm1, %v3547_v33  ;;  %3351 = vmatprep.mubr.msk.f32.mxu1 %vm115_vm0, %v642_v49  ;;  %v400_v6 = vadd.f32 %v3332_v4, %v3054_v62  ;;  %v394_v7 = vpop.f32.mrb[7].mxu0 }
 0x147   :  { %v395_v9 = vadd.f32 %v3054_v62, %v394_v7  ;;  %3573 = vmatprep.subr.msk.bf16.mxu1 %vm4263_vm12, %v4258_v3 }
 0x149   :  { %3345 = vmatmul.mubr.msk.f32.vlgmr.msra.gmra.mrb[8].mxu0 %vm115_vm0, %v413_v50  ;;  %v4273_v10 = vpack.c.bf16 %v400_v6, %v395_v9 }
 0x14a   :  { %3570 = vmatpush3.bf16.xpose.msk.msra.mxu0 %vm4147_vm1, %v4159_v43  ;;  %3358 = vmatprep.mubr.msk.f32.mxu0 %vm115_vm0, %v644_v51 }
 0x14b   :  { %3597 = vmatprep.subr.msk.bf16.mxu0 %vm4147_vm1, %v3547_v33 }
 0x14d   :  { %3352 = vmatmul.mubr.msk.f32.vlgmr.msra.gmra.mrb[6].mxu1 %vm115_vm0, %v643_v52 }
 0x14e   :  { %3576 = vmatpush3.bf16.msk.msra.mxu1 %vm4263_vm12, %v4258_v3 }
 0x14f   :  { %3579 = vmatprep.subr.msk.bf16.mxu1 %vm4263_vm12, %v4273_v10 }
 0x151   :  { %3359 = vmatmul.mubr.msk.f32.vlgmr.msra.gmra.mrb[10].mxu0 %vm115_vm0, %v645_v54 }
 0x152   :  { %3600 = vmatpush3.bf16.xpose.msk.msra.mxu0 %vm4147_vm1, %v3547_v33  ;;  %3393 = vmatprep.mubr.msk.f32.mxu0 %vm115_vm0, %v1185_v55 }
 0x153   :  { %3603 = vmatprep.subr.msk.bf16.mxu0 %vm4147_vm1, %v4159_v43 }
 0x159   :  { %3394 = vmatmul.mubr.msk.f32.vlgmr.msra.gmra.mrb[12].mxu0 %vm115_vm0, %v1186_v56 }
 0x15a   :  { %3606 = vmatpush3.bf16.xpose.msk.msra.mxu0 %vm4147_vm1, %v4159_v43  ;;  %3400 = vmatprep.mubr.msk.f32.mxu0 %vm115_vm0, %v1187_v57 }
 0x15b   :  { %3621 = vmatprep.subr.msk.bf16.mxu0 %vm4147_vm1, %v3547_v33 }
 0x161   :  { %3401 = vmatmul.mubr.msk.f32.vlgmr.msra.gmra.mrb[14].mxu0 %vm115_vm0, %v1188_v59 }
 0x162   :  { %3624 = vmatpush3.bf16.xpose.msk.msra.mxu0 %vm4147_vm1, %v3547_v33  ;;  %3421 = vmatprep.mubr.msk.f32.mxu0 %vm115_vm0, %v1570_v60 }
 0x169   :  { %3422 = vmatmul.mubr.msk.f32.vlgmr.msra.gmra.mrb[16].mxu0 %vm115_vm0, %v1571_v61 }
 0x218   :  { %v4278_v11 = vpop.f32.mrb[4].mxu1 }
 0x219   :  { %v492_v12 = vpop.f32.mrb[5].mxu1  ;;  %v592_v32 = vsel %vm588_vm13, %v4278_v11, -inf }
 0x21a   :  { %v589_v28 = vsel %vm588_vm13, %v492_v12, -inf }
 0x21c   :  { %v4280_v13 = vpop.f32.mrb[8].mxu0 }
 0x21d   :  { %v579_v14 = vpop.f32.mrb[9].mxu0  ;;  %v598_v34 = vsel %vm588_vm13, %v4280_v13, -inf }
 0x21e   :  { %v595_v33 = vsel %vm588_vm13, %v579_v14, -inf }
 0x220   :  { %v3353_v15 = vpop.f32.mrb[6].mxu1 }
 0x221   :  { %v718_v19 = vpop.f32.mrb[7].mxu1  ;;  %v811_v26 = vsel %vm588_vm13, %v3353_v15, -inf }
 0x222   :  { %v808_v20 = vsel %vm588_vm13, %v718_v19, -inf }
 0x223   :  { %809 = vmax.xlane.f32.xlu0 %v808_v20 }
 0x224   :  { %v3360_v21 = vpop.f32.mrb[10].mxu0 }
 0x225   :  { %v799_v23 = vpop.f32.mrb[11].mxu0  ;;  %v817_v27 = vsel %vm588_vm13, %v3360_v21, -inf }
 0x226   :  { %v814_v25 = vsel %vm588_vm13, %v799_v23, -inf }
 0x227   :  { %815 = vmax.xlane.f32.xlu1 %v814_v25  ;;  %812 = vmax.xlane.f32.xlu0 %v811_v26 }
 0x22b   :  { %818 = vmax.xlane.f32.xlu1 %v817_v27  ;;  %590 = vmax.xlane.f32.xlu0 %v589_v28 }
 0x22c   :  { %v4287_v29 = vpop.f32.mrb[12].mxu0 }
 0x22d   :  { %v1261_v30 = vpop.f32.mrb[13].mxu0  ;;  %v1354_v38 = vsel %vm588_vm13, %v4287_v29, -inf }
 0x22e   :  { %v1351_v35 = vsel %vm588_vm13, %v1261_v30, -inf }
 0x22f   :  { %593 = vmax.xlane.f32.xlu1 %v592_v32  ;;  %596 = vmax.xlane.f32.xlu0 %v595_v33 }
 0x233   :  { %599 = vmax.xlane.f32.xlu1 %v598_v34  ;;  %1352 = vmax.xlane.f32.xlu0 %v1351_v35 }
 0x234   :  { %v4295_v36 = vpop.f32.mrb[14].mxu0 }
 0x235   :  { %v1342_v37 = vpop.f32.mrb[15].mxu0  ;;  %v1360_v40 = vsel %vm588_vm13, %v4295_v36, -inf }
 0x236   :  { %v1357_v39 = vsel %vm588_vm13, %v1342_v37, -inf }
 0x237   :  { %1355 = vmax.xlane.f32.xlu1 %v1354_v38  ;;  %1358 = vmax.xlane.f32.xlu0 %v1357_v39 }
 0x23b   :  { %1361 = vmax.xlane.f32.xlu1 %v1360_v40 }
 0x23c   :  { %v4302_v41 = vpop.f32.mrb[16].mxu0 }
 0x23d   :  { %v4304_v42 = vpop.f32.mrb[17].mxu0 }
 0x2b0   :  { %v810_v45 = vpop.xlane.xlu0 %809 }
 0x2b1   :  { %v820_v47 = vsub.f32 %v718_v19, %v810_v45 }
 0x2b3   :  { %v824_v48 = vmul.f32 1.442695, %v820_v47 }
 0x2b4   :  { %v816_v49 = vpop.xlane.xlu1 %815  ;;  %v813_v50 = vpop.xlane.xlu0 %812 }
 0x2b5   :  { %3715 = vpow2.f32 %v824_v48  ;;  %v822_v51 = vsub.f32 %v799_v23, %v816_v49  ;;  %v821_v52 = vsub.f32 %v3353_v15, %v813_v50 }
 0x2b7   :  { %v828_v54 = vmul.f32 1.442695, %v822_v51  ;;  %v826_v55 = vmul.f32 1.442695, %v821_v52 }
 0x2b8   :  { %v819_v56 = vpop.xlane.xlu1 %818  ;;  %v591_v57 = vpop.xlane.xlu0 %590 }
 0x2b9   :  { %3717 = vpow2.f32 %v828_v54  ;;  %v823_v59 = vsub.f32 %v3360_v21, %v819_v56  ;;  %v601_v60 = vsub.f32 %v492_v12, %v591_v57 }
 0x2ba   :  { %3719 = vpow2.f32 %v826_v55 }
 0x2bb   :  { %v830_v61 = vmul.f32 1.442695, %v823_v59  ;;  %v605_v62 = vmul.f32 1.442695, %v601_v60 }
 0x2bc   :  { %v594_v63 = vpop.xlane.xlu1 %593  ;;  %v597_v0 = vpop.xlane.xlu0 %596 }
 0x2bd   :  { %3721 = vpow2.f32 %v830_v61  ;;  %v602_v1 = vsub.f32 %v4278_v11, %v594_v63  ;;  %v603_v2 = vsub.f32 %v579_v14, %v597_v0  ;;  %v1736_v61 = vsel %vm588_vm13, %v4304_v42, -inf }
 0x2be   :  { %3723 = vpow2.f32 %v605_v62  ;;  %v1739_v62 = vsel %vm588_vm13, %v4302_v41, -inf }
 0x2bf   :  { %v4307_v4 = vpop.eup %3715  ;;  %v607_v6 = vmul.f32 1.442695, %v602_v1  ;;  %v609_v7 = vmul.f32 1.442695, %v603_v2 }
 0x2c0   :  { %v600_v9 = vpop.xlane.xlu1 %599  ;;  %v1353_v15 = vpop.xlane.xlu0 %1352  ;;  %v832_v19 = vsel %vm588_vm13, %v4307_v4, 0.0 }
 0x2c1   :  { %3725 = vpow2.f32 %v607_v6  ;;  %v604_v12 = vsub.f32 %v4280_v13, %v600_v9  ;;  %v1363_v20 = vsub.f32 %v1261_v30, %v1353_v15  ;;  %833 = vadd.xlane.f32.xlu0 %v832_v19 }
 0x2c2   :  { %3727 = vpow2.f32 %v609_v7 }
 0x2c3   :  { %v4312_v21 = vpop.eup %3717  ;;  %v611_v11 = vmul.f32 1.442695, %v604_v12  ;;  %v1367_v14 = vmul.f32 1.442695, %v1363_v20 }
 0x2c4   :  { %v4314_v23 = vpop.eup %3719  ;;  %v1356_v25 = vpop.xlane.xlu1 %1355  ;;  %v838_v27 = vsel %vm588_vm13, %v4312_v21, 0.0 }
 0x2c5   :  { %v1359_v26 = vpop.xlane.xlu0 %1358  ;;  %3729 = vpow2.f32 %v611_v11  ;;  %v1364_v28 = vsub.f32 %v4287_v29, %v1356_v25  ;;  %v835_v13 = vsel %vm588_vm13, %v4314_v23, 0.0  ;;  %839 = vadd.xlane.f32.xlu0 %v838_v27 }
 0x2c6   :  { %v1365_v32 = vsub.f32 %v1342_v37, %v1359_v26  ;;  %3731 = vpow2.f32 %v1367_v14  ;;  %836 = vadd.xlane.f32.xlu1 %v835_v13 }
 0x2c7   :  { %v4321_v30 = vpop.eup %3721  ;;  %v1369_v33 = vmul.f32 1.442695, %v1364_v28 }
 0x2c8   :  { %v1371_v34 = vmul.f32 1.442695, %v1365_v32  ;;  %v4323_v35 = vpop.eup %3723  ;;  %v1362_v38 = vpop.xlane.xlu1 %1361  ;;  %v841_v39 = vsel %vm588_vm13, %v4321_v30, 0.0 }
 0x2c9   :  { %3733 = vpow2.f32 %v1369_v33  ;;  %v1366_v29 = vsub.f32 %v4295_v36, %v1362_v38  ;;  %v613_v37 = vsel %vm588_vm13, %v4323_v35, 0.0 }
 0x2ca   :  { %3735 = vpow2.f32 %v1371_v34  ;;  %842 = vadd.xlane.f32.xlu1 %v841_v39  ;;  %614 = vadd.xlane.f32.xlu0 %v613_v37 }
 0x2cb   :  { %v4330_v40 = vpop.eup %3725  ;;  %v1373_v45 = vmul.f32 1.442695, %v1366_v29 }
 0x2cc   :  { %v4332_v47 = vpop.eup %3727  ;;  %v616_v48 = vsel %vm588_vm13, %v4330_v40, 0.0 }
 0x2cd   :  { %3737 = vpow2.f32 %v1373_v45  ;;  %v619_v49 = vsel %vm588_vm13, %v4332_v47, 0.0 }
 0x2ce   :  { %617 = vadd.xlane.f32.xlu1 %v616_v48  ;;  %620 = vadd.xlane.f32.xlu0 %v619_v49 }
 0x2cf   :  { %v4338_v36 = vpop.eup %3729 }
 0x2d0   :  { %v4340_v50 = vpop.eup %3731  ;;  %v622_v51 = vsel %vm588_vm13, %v4338_v36, 0.0 }
 0x2d1   :  { %v1375_v52 = vsel %vm588_vm13, %v4340_v50, 0.0 }
 0x2d2   :  { %623 = vadd.xlane.f32.xlu1 %v622_v51  ;;  %1376 = vadd.xlane.f32.xlu0 %v1375_v52 }
 0x2d3   :  { %v4346_v54 = vpop.eup %3733 }
 0x2d4   :  { %v4348_v55 = vpop.eup %3735  ;;  %v1378_v56 = vsel %vm588_vm13, %v4346_v54, 0.0 }
 0x2d5   :  { %v1381_v57 = vsel %vm588_vm13, %v4348_v55, 0.0 }
 0x2d6   :  { %1379 = vadd.xlane.f32.xlu1 %v1378_v56  ;;  %1382 = vadd.xlane.f32.xlu0 %v1381_v57 }
 0x2d7   :  { %v4354_v59 = vpop.eup %3737 }
 0x2d8   :  { %v1384_v60 = vsel %vm588_vm13, %v4354_v59, 0.0 }
 0x2da   :  { %1385 = vadd.xlane.f32.xlu1 %v1384_v60  ;;  %1737 = vmax.xlane.f32.xlu0 %v1736_v61 }
 0x2de   :  { %1740 = vmax.xlane.f32.xlu1 %v1739_v62 }
 0x34e   :  { %v834_v63 = vpop.xlane.xlu0 %833 }
 0x34f   :  { %3739 = vrcp.f32 %v834_v63 }
 0x352   :  { %v840_v0 = vpop.xlane.xlu0 %839 }
 0x353   :  { %v837_v1 = vpop.xlane.xlu1 %836  ;;  %3741 = vrcp.f32 %v840_v0 }
 0x354   :  { %3743 = vrcp.f32 %v837_v1 }
 0x357   :  { %v843_v2 = vpop.xlane.xlu1 %842  ;;  %v615_v6 = vpop.xlane.xlu0 %614 }
 0x358   :  { %3745 = vrcp.f32 %v843_v2 }
 0x359   :  { %v3740_v7 = vpop.eup %3739  ;;  %3747 = vrcp.f32 %v615_v6 }
 0x35a   :  { %v848_v9 = vmul.f32 %v3740_v7, %v4307_v4  ;;  %v1952_v4 = vld [vmem:[#allocation7 + $0x10] sm:$0xff] }
 0x35b   :  { %v618_v15 = vpop.xlane.xlu1 %617  ;;  %v621_v19 = vpop.xlane.xlu0 %620 }
 0x35c   :  { %3749 = vrcp.f32 %v618_v15  ;;  %3365 = vmatprep.mubr.msk.f32.mxu1 %vm588_vm13, %v848_v9 }
 0x35d   :  { %v3742_v12 = vpop.eup %3741  ;;  %3751 = vrcp.f32 %v621_v19 }
 0x35e   :  { %v3744_v20 = vpop.eup %3743  ;;  %v850_v11 = vmul.f32 %v3742_v12, %v4312_v21 }
 0x35f   :  { %v849_v14 = vmul.f32 %v3744_v20, %v4314_v23  ;;  %v624_v25 = vpop.xlane.xlu1 %623  ;;  %v1377_v26 = vpop.xlane.xlu0 %1376 }
 0x360   :  { %3753 = vrcp.f32 %v624_v25  ;;  %v1950_v25 = vld [vmem:[#allocation7] sm:$0xff] }
 0x361   :  { %3755 = vrcp.f32 %v1377_v26  ;;  %3366 = vmatmul.mubr.msk.f32.vlgmr.msra.gmra.mrb[8].mxu1 %vm588_vm13, %v849_v14  ;;  %v1951_v26 = vld [vmem:[#allocation7 + $0x8] sm:$0xff] }
 0x362   :  { %v3746_v27 = vpop.eup %3745  ;;  %3582 = vmatpush3.bf16.msk.msra.mxu1 %vm4263_vm12, %v4273_v10  ;;  %3372 = vmatprep.mubr.msk.f32.mxu1 %vm588_vm13, %v850_v11 }
 0x363   :  { %v3748_v21 = vpop.eup %3747  ;;  %v851_v23 = vmul.f32 %v3746_v27, %v4321_v30  ;;  %3585 = vmatprep.subr.msk.bf16.mxu1 %vm4369_vm14, %v4258_v3  ;;  %v1380_v24 = vpop.xlane.xlu1 %1379  ;;  %v3643_v27 = vpack.c.bf16 %v1951_v26, %v1950_v25 }
 0x364   :  { %v1383_v28 = vpop.xlane.xlu0 %1382  ;;  %3757 = vrcp.f32 %v1380_v24  ;;  %v629_v32 = vmul.f32 %v3748_v21, %v4323_v35  ;;  %v1953_v21 = vld [vmem:[#allocation7 + $0x18] sm:$0xff]  ;;  %v2431_v24 = vld [vmem:[#allocation8] sm:$0xff] }
 0x365   :  { %3759 = vrcp.f32 %v1383_v28  ;;  %3373 = vmatmul.mubr.msk.f32.vlgmr.msra.gmra.mrb[10].mxu1 %vm588_vm13, %v851_v23  ;;  %v3647_v23 = vpack.c.bf16 %v1953_v21, %v1952_v4  ;;  %3644 = vmatprep.subr.bf16.mxu0 %v3643_v27  ;;  %v2432_v28 = vld [vmem:[#allocation8 + $0x8] sm:$0xff]  ;;  %v2269_v4 = vrot.slane %v4110_v16, 1 }
 0x366   :  { %v3750_v13 = vpop.eup %3749  ;;  %3588 = vmatpush3.bf16.msk.msra.mxu1 %vm4369_vm14, %v4258_v3  ;;  %3379 = vmatprep.mubr.msk.f32.mxu1 %vm588_vm13, %v629_v32  ;;  %v3651_v32 = vpack.c.bf16 %v2432_v28, %v2431_v24  ;;  %v2170_v24 = vrot.slane %v4112_v17, 6 }
 0x367   :  { %v3752_v8 = vpop.eup %3751  ;;  %v630_v30 = vmul.f32 %v3750_v13, %v4330_v40  ;;  %3591 = vmatprep.subr.msk.bf16.mxu1 %vm4369_vm14, %v4273_v10  ;;  %v1386_v33 = vpop.xlane.xlu1 %1385  ;;  %3646 = vmatpush3.bf16.msra.mxu0 %v3643_v27  ;;  %v2270_v27 = vrot.slane %v4112_v17, 1 }
 0x368   :  { %3761 = vrcp.f32 %v1386_v33  ;;  %v631_v34 = vmul.f32 %v3752_v8, %v4332_v47  ;;  %3648 = vmatprep.subr.bf16.mxu0 %v3647_v23 }
 0x369   :  { %3380 = vmatmul.mubr.msk.f32.vlgmr.msra.gmra.mrb[8].mxu1 %vm588_vm13, %v630_v30 }
 0x36a   :  { %v3754_v38 = vpop.eup %3753  ;;  %3594 = vmatpush3.bf16.msk.msra.mxu1 %vm4369_vm14, %v4273_v10  ;;  %3386 = vmatprep.mubr.msk.f32.mxu1 %vm588_vm13, %v631_v34 }
 0x36b   :  { %v3756_v39 = vpop.eup %3755  ;;  %v632_v29 = vmul.f32 %v3754_v38, %v4338_v36  ;;  %3609 = vmatprep.subr.msk.bf16.mxu1 %vm4396_vm15, %v4258_v3  ;;  %v1572_v36 = vsel %vm4242_vm11, %v4163_v44, 0.0  ;;  %v1573_v44 = vsel %vm4242_vm11, %v4176_v46, 0.0  ;;  %v1741_v31 = vpop.xlane.xlu1 %1740  ;;  %3650 = vmatpush3.bf16.msra.mxu0 %v3647_v23 }
 0x36c   :  { %v1391_v53 = vmul.f32 %v3756_v39, %v4340_v50  ;;  %v1749_v51 = vsub.f32 %v4302_v41, %v1741_v31  ;;  %3652 = vmatprep.subr.bf16.mxu0 %v3651_v32  ;;  %v2433_v39 = vld [vmem:[#allocation8 + $0x10] sm:$0xff]  ;;  %v2169_v31 = vrot.slane %v4110_v16, 6 }
 0x36d   :  { %3387 = vmatmul.mubr.msk.f32.vlgmr.msra.gmra.mrb[10].mxu1 %vm588_vm13, %v632_v29  ;;  %v2434_v29 = vld [vmem:[#allocation8 + $0x18] sm:$0xff] }
 0x36e   :  { %v3758_v37 = vpop.eup %3757  ;;  %3612 = vmatpush3.bf16.msk.msra.mxu1 %vm4396_vm15, %v4258_v3  ;;  %3407 = vmatprep.mubr.msk.f32.mxu1 %vm588_vm13, %v1391_v53  ;;  %v3655_v53 = vpack.c.bf16 %v2434_v29, %v2433_v39 }
 0x36f   :  { %v3760_v40 = vpop.eup %3759  ;;  %v1392_v45 = vmul.f32 %v3758_v37, %v4346_v54  ;;  %3615 = vmatprep.subr.msk.bf16.mxu1 %vm4396_vm15, %v4273_v10  ;;  %v1754_v54 = vmul.f32 1.442695, %v1749_v51  ;;  %v4475_v37 = vshrl.u32 %v403_v22, 7  ;;  %v2171_v51 = vrot.slane %v4118_v18, 6 }
 0x370   :  { %v1393_v47 = vmul.f32 %v3760_v40, %v4348_v55 }
 0x371   :  { %3408 = vmatmul.mubr.msk.f32.vlgmr.msra.gmra.mrb[8].mxu1 %vm588_vm13, %v1392_v45  ;;  %3763 = vpow2.f32 %v1754_v54  ;;  %v2065_v40 = vand.u32 15, %v4475_v37  ;;  %v2118_v45 = vrot.slane %v4086_v5, 5  ;;  %vm2172_vm4 = vcmp.lt.s32.totalorder %v4475_v37, 2 }
 0x372   :  { %v3762_v48 = vpop.eup %3761  ;;  %3618 = vmatpush3.bf16.msk.msra.mxu1 %vm4396_vm15, %v4273_v10  ;;  %3414 = vmatprep.mubr.msk.f32.mxu1 %vm588_vm13, %v1393_v47  ;;  %v2119_v47 = vrot.slane %v4110_v16, 5  ;;  %v2059_v54 = vadd.s32 16, %v4475_v37  ;;  %vm2222_vm6 = vcmp.lt.s32.totalorder %v4475_v37, 1  ;;  %vm2272_vm8 = vcmp.lt.s32.totalorder %v4475_v37, 7 }
 0x373   :  { %v1394_v49 = vmul.f32 %v3762_v48, %v4354_v59  ;;  %3627 = vmatprep.subr.msk.bf16.mxu1 %vm4147_vm1, %v4159_v43  ;;  %v2121_v48 = vrot.slane %v4118_v18, 5  ;;  %vm2322_vm12 = vcmp.lt.s32.totalorder %v4475_v37, 6  ;;  %vm2372_vm15 = vcmp.lt.s32.totalorder %v4475_v37, 5 }
 0x375   :  { %3415 = vmatmul.mubr.msk.f32.vlgmr.msra.gmra.mrb[10].mxu1 %vm588_vm13, %v1394_v49  ;;  %v2127_v49 = vadd.s32 4294967293, %v2065_v40 }
 0x376   :  { %3428 = vmatprep.mubr.msk.f32.mxu1 %vm115_vm0, %v1572_v36  ;;  %v4485_v36 = vld [vmem:[%s4754_s4 + $0x3] ss:$0 sm:$0xff] }
 0x377   :  { %vm2131_vm3 = vcmp.ge.s32.totalorder %v2127_v49, 0 }
 0x37b   :  { %3630 = vmatpush3.bf16.xpose.msk.msra.mxu1 %vm4147_vm1, %v4159_v43  ;;  %v1738_v43 = vpop.xlane.xlu0 %1737  ;;  %v3764_v57 = vpop.eup %3763  ;;  %vm2122_vm1 = vcmp.lt.s32.totalorder %v4475_v37, 3 }
 0x37c   :  { %3633 = vmatprep.subr.msk.bf16.mxu1 %vm4437_vm2, %v4258_v3  ;;  %v1748_v52 = vsub.f32 %v4304_v42, %v1738_v43  ;;  %v1763_v60 = vsel %vm588_vm13, %v3764_v57, 0.0  ;;  %v2125_v22 = vsel %vm2122_vm1, %v2118_v45, %v2119_v47  ;;  %v2126_v50 = vsel %vm2122_vm1, %v2121_v48, %v2118_v45 }
 0x37d   :  { %v2168_v43 = vrot.slane %v4086_v5, 6  ;;  %v2319_v45 = vrot.slane %v4110_v16, 2 }
 0x37e   :  { %v1752_v55 = vmul.f32 1.442695, %v1748_v52  ;;  %v2177_v52 = vadd.s32 4294967294, %v2065_v40 }
 0x380   :  { %3765 = vpow2.f32 %v1752_v55  ;;  %v2115_v55 = vmul.f32 %v4485_v36, %v4110_v16  ;;  %vm2181_vm5 = vcmp.ge.s32.totalorder %v2177_v52, 0 }
 0x382   :  { %3429 = vmatmul.mubr.msk.f32.vlgmr.msra.gmra.mrb[12].mxu1 %vm115_vm0, %v1573_v44  ;;  %v4496_v44 = vld [vmem:[%s4754_s4] ss:$0 sm:$0xff] }
 0x383   :  { %3636 = vmatpush3.bf16.msk.msra.mxu1 %vm4437_vm2, %v4258_v3 }
 0x384   :  { %3639 = vmatprep.subr.msk.bf16.mxu1 %vm4437_vm2, %v4273_v10 }
 0x38a   :  { %v3766_v59 = vpop.eup %3765 }
 0x38b   :  { %v1760_v41 = vsel %vm588_vm13, %v3766_v59, 0.0 }
 0x455   :  { %v3430_v46 = vpop.f32.mrb[12].mxu1 }
 0x456   :  { %v1727_v58 = vpop.f32.mrb[13].mxu1  ;;  %v1745_v56 = vsel %vm588_vm13, %v3430_v46, -inf }
 0x457   :  { %1746 = vmax.xlane.f32.xlu1 %v1745_v56  ;;  %v1742_v3 = vsel %vm588_vm13, %v1727_v58, -inf  ;;  %v2175_v56 = vsel %vm2172_vm4, %v2168_v43, %v2169_v31 }
 0x458   :  { %1743 = vmax.xlane.f32.xlu0 %v1742_v3  ;;  %v2058_v3 = vadd.s32 8, %v4475_v37 }
 0x45b   :  { %1764 = vadd.xlane.f32.xlu1 %v1763_v60  ;;  %v2219_v60 = vrot.slane %v4110_v16, 7 }
 0x45c   :  { %1761 = vadd.xlane.f32.xlu0 %v1760_v41  ;;  %v2114_v41 = vmul.f32 %v4485_v36, %v4086_v5 }
 0x4e4   :  { %v1747_v42 = vpop.xlane.xlu1 %1746 }
 0x4e5   :  { %v1751_v61 = vsub.f32 %v3430_v46, %v1747_v42  ;;  %v1744_v62 = vpop.xlane.xlu0 %1743  ;;  %v2161_v46 = vmul.f32 %v4496_v44, %v2125_v22  ;;  %v2079_v42 = vand.u32 15, %v2059_v54  ;;  %v2116_v22 = vmul.f32 %v4485_v36, %v4112_v17 }
 0x4e6   :  { %v1750_v63 = vsub.f32 %v1727_v58, %v1744_v62  ;;  %v2151_v58 = vsel %vm2131_vm3, %v2126_v50, 0.0 }
 0x4e7   :  { %v1758_v0 = vmul.f32 1.442695, %v1751_v61  ;;  %v2160_v61 = vmul.f32 %v4496_v44, %v2151_v58  ;;  %v2165_v62 = vadd.f32 %v2161_v46, %v2115_v55  ;;  %v2179_v28 = vadd.s32 4294967294, %v2079_v42 }
 0x4e8   :  { %v1756_v1 = vmul.f32 1.442695, %v1750_v63  ;;  %v1765_v2 = vpop.xlane.xlu1 %1764  ;;  %v2229_v39 = vadd.s32 4294967295, %v2079_v42 }
 0x4e9   :  { %3767 = vpow2.f32 %v1758_v0  ;;  %v1762_v6 = vpop.xlane.xlu0 %1761  ;;  %v2218_v0 = vrot.slane %v4086_v5, 7  ;;  %vm2183_vm11 = vcmp.ge.s32.totalorder %v2179_v28, 0 }
 0x4ea   :  { %3769 = vpow2.f32 %v1756_v1 }
 0x4eb   :  { %3771 = vrcp.f32 %v1765_v2  ;;  %v2221_v2 = vrot.slane %v4118_v18, 7 }
 0x4ec   :  { %3773 = vrcp.f32 %v1762_v6  ;;  %v2227_v6 = vadd.s32 4294967295, %v2065_v40  ;;  %v4566_v40 = vld [vmem:[%s4754_s4 + $0x4] ss:$0 sm:$0xff] }
 0x4ed   :  { %v2226_v25 = vsel %vm2222_vm6, %v2221_v2, %v2218_v0 }
 0x4ee   :  { %vm2231_vm7 = vcmp.ge.s32.totalorder %v2227_v6, 0  ;;  %v2370_v6 = vrot.slane %v4112_v17, 3 }
 0x4f3   :  { %v3768_v7 = vpop.eup %3767 }
 0x4f4   :  { %v3770_v9 = vpop.eup %3769  ;;  %v1769_v15 = vsel %vm588_vm13, %v3768_v7, 0.0 }
 0x4f5   :  { %v3772_v19 = vpop.eup %3771  ;;  %1770 = vadd.xlane.f32.xlu1 %v1769_v15  ;;  %v1766_v12 = vsel %vm588_vm13, %v3770_v9, 0.0  ;;  %v4533_v15 = vld [vmem:[%s4754_s4 + $0x2] ss:$0 sm:$0xff] }
 0x4f6   :  { %v3774_v20 = vpop.eup %3773  ;;  %1767 = vadd.xlane.f32.xlu0 %v1766_v12  ;;  %v1777_v14 = vmul.f32 %v3772_v19, %v3764_v57  ;;  %v4511_v57 = vld [vmem:[%s4754_s4 + $0x1] ss:$0 sm:$0xff]  ;;  %v2120_v19 = vrot.slane %v4112_v17, 5  ;;  %v2129_v12 = vadd.s32 4294967293, %v2079_v42 }
 0x4f7   :  { %v1776_v11 = vmul.f32 %v3774_v20, %v3766_v59  ;;  %v2176_v59 = vsel %vm2172_vm4, %v2171_v51, %v2168_v43  ;;  %v2211_v63 = vmul.f32 %v4511_v57, %v2175_v56  ;;  %v2164_v20 = vadd.f32 %v2160_v61, %v2114_v41 }
 0x4f8   :  { %v2201_v1 = vsel %vm2181_vm5, %v2176_v59, 0.0  ;;  %v2124_v23 = vsel %vm2122_vm1, %v2119_v47, %v2120_v19  ;;  %vm2133_vm9 = vcmp.ge.s32.totalorder %v2129_v12, 0  ;;  %v2320_v47 = vrot.slane %v4112_v17, 2 }
 0x4f9   :  { %3435 = vmatprep.mubr.msk.f32.mxu1 %vm588_vm13, %v1776_v11  ;;  %v2210_v11 = vmul.f32 %v4511_v57, %v2201_v1  ;;  %v2318_v43 = vrot.slane %v4086_v5, 2  ;;  %v2369_v1 = vrot.slane %v4110_v16, 3  ;;  %vm2752_vm5 = vcmask 523264  }
 0x4fa   :  { %3436 = vmatmul.mubr.msk.f32.vlgmr.msra.gmra.mrb[8].mxu1 %vm588_vm13, %v1777_v14  ;;  %v2215_v14 = vadd.f32 %v2211_v63, %v2165_v62  ;;  %v2324_v59 = vsel %vm2322_vm12, %v2319_v45, %v2320_v47  ;;  %v2271_v63 = vrot.slane %v4118_v18, 1 }
 0x4fb   :  { %3642 = vmatpush3.bf16.msk.msra.mxu1 %vm4437_vm2, %v4273_v10  ;;  %v2325_v61 = vsel %vm2322_vm12, %v2318_v43, %v2319_v45 }
 0x582   :  { %v1771_v13 = vpop.xlane.xlu1 %1770 }
 0x583   :  { %3775 = vrcp.f32 %v1771_v13  ;;  %v1768_v8 = vpop.xlane.xlu0 %1767  ;;  %v2214_v13 = vadd.f32 %v2210_v11, %v2164_v20 }
 0x584   :  { %3777 = vrcp.f32 %v1768_v8  ;;  %v2251_v8 = vsel %vm2231_vm7, %v2226_v25, 0.0  ;;  %v2273_v25 = vsel %vm2272_vm8, %v2270_v27, %v2271_v63 }
 0x585   :  { %v2260_v29 = vmul.f32 %v4533_v15, %v2251_v8  ;;  %v2312_v28 = vmul.f32 %v4566_v40, %v2273_v25  ;;  %v2541_v25 = vld [vmem:[#allocation10] sm:$0xff] }
 0x587   :  { %v2264_v56 = vadd.f32 %v2260_v29, %v2214_v13 }
 0x58d   :  { %v3776_v30 = vpop.eup %3775 }
 0x58e   :  { %v3778_v10 = vpop.eup %3777  ;;  %v1779_v34 = vmul.f32 %v3776_v30, %v3768_v7  ;;  %v4526_v7 = vand.u32 15, %v2058_v3 }
 0x58f   :  { %v1778_v33 = vmul.f32 %v3778_v10, %v3770_v9  ;;  %v2225_v9 = vsel %vm2222_vm6, %v2218_v0, %v2219_v60  ;;  %v2274_v10 = vsel %vm2272_vm8, %v2269_v4, %v2270_v27  ;;  %v3134_v27 = vld [vmem:[%s4754_s4 + $0x6] ss:$0 sm:$0xff] }
 0x590   :  { %v2261_v26 = vmul.f32 %v4533_v15, %v2225_v9  ;;  %v2278_v21 = vadd.s32 1, %v4526_v7  ;;  %v2328_v46 = vadd.s32 2, %v4526_v7  ;;  %v2378_v9 = vadd.s32 3, %v4526_v7 }
 0x591   :  { %3442 = vmatprep.mubr.msk.f32.mxu1 %vm588_vm13, %v1778_v33  ;;  %v2153_v33 = vsel %vm2133_vm9, %v2124_v23, 0.0 }
 0x592   :  { %3443 = vmatmul.mubr.msk.f32.vlgmr.msra.gmra.mrb[10].mxu1 %vm588_vm13, %v1779_v34  ;;  %v4550_v30 = vadd.f32 %v2261_v26, %v2215_v14  ;;  %vm2286_vm10 = vcmp.lt.s32.totalorder %v2278_v21, 16  ;;  %v2060_v34 = vadd.s32 24, %v4475_v37  ;;  %v2162_v50 = vmul.f32 %v4496_v44, %v2153_v33 }
 0x593   :  { %v2302_v49 = vsel %vm2286_vm10, %v2274_v10, 0.0  ;;  %vm2233_vm13 = vcmp.ge.s32.totalorder %v2229_v39, 0  ;;  %vm2336_vm14 = vcmp.lt.s32.totalorder %v2328_v46, 16  ;;  %v2321_v14 = vrot.slane %v4118_v18, 2 }
 0x594   :  { %v2086_v54 = vand.u32 15, %v2060_v34  ;;  %v2311_v3 = vmul.f32 %v4566_v40, %v2302_v49  ;;  %v2166_v41 = vadd.f32 %v2162_v50, %v2116_v22 }
 0x595   :  { %v2323_v10 = vsel %vm2322_vm12, %v2320_v47, %v2321_v14  ;;  %v2326_v33 = vsel %vm2322_vm12, %v2321_v14, %v2318_v43  ;;  %v2548_v14 = vld [vmem:[#allocation10 + $0x38] sm:$0xff] }
 0x596   :  { %v2315_v34 = vadd.f32 %v2311_v3, %v4550_v30 }
 0x5cd   :  { %v3437_v35 = vpop.f32.mrb[8].mxu1 }
 0x5ce   :  { %v1856_v38 = vpop.f32.mrb[9].mxu1 }
 0x5cf   :  { %3453 = vmatprep.mubr.msk.f32.mxu0 %vm115_vm0, %v1856_v38  ;;  %v2220_v38 = vrot.slane %v4112_v17, 7 }
 0x5d0   :  { %3454 = vmatmul.mubr.msk.f32.vlgmr.msra.gmra.mrb[18].mxu0 %vm115_vm0, %v3437_v35  ;;  %v2174_v35 = vsel %vm2172_vm4, %v2169_v31, %v2170_v24  ;;  %v2123_v31 = vsel %vm2122_vm1, %v2120_v19, %v2121_v48  ;;  %v2117_v48 = vmul.f32 %v4485_v36, %v4118_v18  ;;  %v2280_v36 = vadd.s32 1, %v2086_v54 }
 0x5d1   :  { %3654 = vmatpush3.bf16.msra.mxu0 %v3651_v32  ;;  %v2268_v32 = vrot.slane %v4086_v5, 1  ;;  %v2203_v52 = vsel %vm2183_vm11, %v2174_v35, 0.0  ;;  %v2224_v58 = vsel %vm2222_vm6, %v2219_v60, %v2220_v38  ;;  %v2163_v5 = vmul.f32 %v4496_v44, %v2123_v31  ;;  %v4597_v44 = vld [vmem:[#allocation2] sm:$0xff] }
 0x5d2   :  { %3656 = vmatprep.subr.bf16.mxu0 %v3655_v53  ;;  %v2212_v42 = vmul.f32 %v4511_v57, %v2203_v52  ;;  %v2173_v60 = vsel %vm2172_vm4, %v2170_v24, %v2171_v51  ;;  %v2253_v62 = vsel %vm2233_vm13, %v2224_v58, 0.0  ;;  %v2368_v0 = vrot.slane %v4597_v44, 3  ;;  %v3133_v51 = vld [vmem:[%s4754_s4 + $0x5] ss:$0 sm:$0xff] }
 0x5d3   :  { %v2167_v19 = vadd.f32 %v2163_v5, %v2117_v48  ;;  %v2213_v12 = vmul.f32 %v4511_v57, %v2173_v60  ;;  %v2262_v11 = vmul.f32 %v4533_v15, %v2253_v62  ;;  %v2223_v16 = vsel %vm2222_vm6, %v2220_v38, %v2221_v2 }
 0x5d4   :  { %v2216_v20 = vadd.f32 %v2212_v42, %v2166_v41  ;;  %v2276_v7 = vsel %vm2272_vm8, %v2271_v63, %v2268_v32  ;;  %vm2288_vm2 = vcmp.lt.s32.totalorder %v2280_v36, 16  ;;  %v2330_v57 = vadd.s32 2, %v2086_v54 }
 0x5d5   :  { %3658 = vmatpush3.bf16.msra.mxu0 %v3655_v53  ;;  %v2275_v53 = vsel %vm2272_vm8, %v2268_v32, %v2269_v4  ;;  %v2352_v4 = vsel %vm2336_vm14, %v2324_v59, 0.0  ;;  %v2360_v21 = vmul.f32 %v3133_v51, %v2325_v61  ;;  %v2374_v18 = vsel %vm2372_vm15, %v2369_v1, %v2370_v6  ;;  %v4630_v32 = vld [vmem:[#allocation2 + $0x18] sm:$0xff] }
 0x5d6   :  { %v2310_v55 = vmul.f32 %v4566_v40, %v2275_v53  ;;  %v2375_v2 = vsel %vm2372_vm15, %v2368_v0, %v2369_v1  ;;  %vm2386_vm1 = vcmp.lt.s32.totalorder %v2378_v9, 16  ;;  %v2217_v17 = vadd.f32 %v2213_v12, %v2167_v19  ;;  %v2545_v19 = vld [vmem:[#allocation10 + $0x20] sm:$0xff]  ;;  %v2546_v12 = vld [vmem:[#allocation10 + $0x28] sm:$0xff] }
 0x5d7   :  { %v2263_v23 = vmul.f32 %v4533_v15, %v2223_v16  ;;  %v2266_v24 = vadd.f32 %v2262_v11, %v2216_v20  ;;  %v2371_v13 = vrot.slane %v4630_v32, 3  ;;  %v2304_v8 = vsel %vm2288_vm2, %v2276_v7, 0.0  ;;  %v2547_v11 = vld [vmem:[#allocation10 + $0x30] sm:$0xff]  ;;  %v2542_v7 = vld [vmem:[#allocation10 + $0x8] sm:$0xff] }
 0x5d8   :  { %v2314_v26 = vadd.f32 %v2310_v55, %v2264_v56  ;;  %vm2338_vm3 = vcmp.lt.s32.totalorder %v2330_v57, 16  ;;  %v2380_v15 = vadd.s32 3, %v2086_v54  ;;  %v2361_v35 = vmul.f32 %v3133_v51, %v2352_v4  ;;  %v3135_v56 = vld [vmem:[%s4758_s8 + $0x1] ss:$0 sm:$0xff] }
 0x5d9   :  { %v2410_v39 = vmul.f32 %v3134_v27, %v2375_v2  ;;  %v2267_v29 = vadd.f32 %v2263_v23, %v2217_v17  ;;  %v2313_v53 = vmul.f32 %v4566_v40, %v2304_v8  ;;  %v2402_v45 = vsel %vm2386_vm1, %v2374_v18, 0.0 }
 0x5da   :  { %v2364_v38 = vadd.f32 %v2360_v21, %v2314_v26  ;;  %v2316_v49 = vadd.f32 %v2312_v28, %v2266_v24  ;;  %v2362_v22 = vmul.f32 %v3133_v51, %v2323_v10  ;;  %v2354_v50 = vsel %vm2338_vm3, %v2326_v33, 0.0  ;;  %v3136_v21 = vld [vmem:[%s4758_s8 + $0x2] ss:$0 sm:$0xff] }
 0x5db   :  { %v2373_v47 = vsel %vm2372_vm15, %v2370_v6, %v2371_v13  ;;  %v2376_v31 = vsel %vm2372_vm15, %v2371_v13, %v2368_v0  ;;  %vm2388_vm4 = vcmp.lt.s32.totalorder %v2380_v15, 16  ;;  %v2365_v43 = vadd.f32 %v2361_v35, %v2315_v34  ;;  %v2544_v24 = vld [vmem:[#allocation10 + $0x18] sm:$0xff] }
 0x5dc   :  { %v2411_v30 = vmul.f32 %v3134_v27, %v2402_v45  ;;  %v2317_v52 = vadd.f32 %v2313_v53, %v2267_v29  ;;  %v2363_v54 = vmul.f32 %v3133_v51, %v2354_v50  ;;  %v2414_v55 = vadd.f32 %v2410_v39, %v2364_v38  ;;  %v3123_v35 = vld [vmem:[%s4758_s8] ss:$0 sm:$0xff] }
 0x5dd   :  { %v2366_v46 = vadd.f32 %v2362_v22, %v2316_v49  ;;  %v2412_v58 = vmul.f32 %v3134_v27, %v2373_v47  ;;  %v2404_v40 = vsel %vm2388_vm4, %v2376_v31, 0.0  ;;  %v3659_v20 = vpack.c.bf16 %v2546_v12, %v2545_v19  ;;  %v3149_v22 = vld [vmem:[%s4759_s9] ss:$0 sm:$0xff] }
 0x5de   :  { %v2415_v3 = vadd.f32 %v2411_v30, %v2365_v43  ;;  %v2367_v48 = vadd.f32 %v2363_v54, %v2317_v52  ;;  %v2413_v5 = vmul.f32 %v3134_v27, %v2404_v40  ;;  %v2423_v59 = vadd.f32 %v3135_v56, %v2414_v55  ;;  %v2543_v27 = vld [vmem:[#allocation10 + $0x10] sm:$0xff] }
 0x5df   :  { %v2416_v41 = vadd.f32 %v2412_v58, %v2366_v46  ;;  %3660 = vmatprep.subr.bf16.mxu1 %v3659_v20  ;;  %v3663_v16 = vpack.c.bf16 %v2548_v14, %v2547_v11  ;;  %v3667_v57 = vpack.c.bf16 %v2542_v7, %v2541_v25  ;;  %v3671_v15 = vpack.c.bf16 %v2544_v24, %v2543_v27  ;;  %v2828_v11 = vld [vmem:[%s4757_s7] sm:$0xff]  ;;  %v2829_v14 = vld [vmem:[%s4757_s7 + $0x8] sm:$0xff]  ;;  %v2830_v25 = vld [vmem:[%s4757_s7 + $0x10] sm:$0xff] }
 0x5e0   :  { %v2424_v37 = vadd.f32 %v3135_v56, %v2415_v3  ;;  %v2417_v42 = vadd.f32 %v2413_v5, %v2367_v48  ;;  %v2427_v61 = vmax.f32 %v2423_v59, 0.0  ;;  %3662 = vmatpush3.bf16.msra.mxu1 %v3659_v20  ;;  %v2831_v7 = vld [vmem:[%s4757_s7 + $0x18] sm:$0xff] }
 0x5e1   :  { %v2425_v62 = vadd.f32 %v3135_v56, %v2416_v41  ;;  %3664 = vmatprep.subr.bf16.mxu1 %v3663_v16 }
 0x5e2   :  { %v2428_v36 = vmax.f32 %v2424_v37, 0.0  ;;  %v2426_v0 = vadd.f32 %v3135_v56, %v2417_v42 }
 0x5e3   :  { %v2429_v1 = vmax.f32 %v2425_v62, 0.0 }
 0x5e4   :  { %v2430_v6 = vmax.f32 %v2426_v0, 0.0  ;;  %3666 = vmatpush3.bf16.msra.mxu1 %v3663_v16  ;;  %v3675_v16 = vpack.c.bf16 %v2829_v14, %v2828_v11 }
 0x5e5   :  { %3668 = vmatprep.subr.bf16.mxu1 %v3667_v57 }
 0x5e6   :  { %3676 = vmatprep.subr.bf16.mxu0 %v3675_v16 }
 0x665   :  { %v3444_v60 = vpop.f32.mrb[10].mxu1 }
 0x666   :  { %v1937_v63 = vpop.f32.mrb[11].mxu1 }
 0x667   :  { %3456 = vmatprep.mubr.msk.f32.mxu0 %vm115_vm0, %v1937_v63 }
 0x668   :  { %3457 = vmatmul.mubr.msk.f32.gmra.mrb[20].mxu0 %vm115_vm0, %v3444_v60 }
 0x669   :  { %3467 = vmatprep.mubr.msk.f32.mxu0 %vm115_vm0, %v2427_v61 }
 0x66c   :  { %3468 = vmatmul.mubr.msk.f32.vlgmr.msra.gmra.mrb[22].mxu0 %vm115_vm0, %v2428_v36 }
 0x66d   :  { %3470 = vmatprep.mubr.msk.f32.mxu0 %vm115_vm0, %v2429_v1  ;;  %3678 = vmatpush3.bf16.msra.mxu0 %v3675_v16 }
 0x670   :  { %3471 = vmatmul.mubr.msk.f32.gmra.mrb[24].mxu0 %vm115_vm0, %v2430_v6 }
 0x6a3   :  { %v3455_v51 = vpop.f32.mrb[18].mxu0 }
 0x6a4   :  { %v2037_v9 = vpop.f32.mrb[19].mxu0  ;;  %v2043_v53 = vadd.f32 %v3455_v51, %v3123_v35 }
 0x6a5   :  { %v2038_v29 = vadd.f32 %v3123_v35, %v2037_v9 }
 0x73b   :  { %v3458_v26 = vpop.f32.mrb[20].mxu0 }
 0x73c   :  { %v2047_v4 = vpop.f32.mrb[21].mxu0  ;;  %v2053_v49 = vadd.f32 %v3458_v26, %v3123_v35  ;;  %v2832_v26 = vld [vmem:[%s4757_s7 + $0x20] sm:$0xff] }
 0x73d   :  { %v2048_v45 = vadd.f32 %v3123_v35, %v2047_v4  ;;  %v2833_v4 = vld [vmem:[%s4757_s7 + $0x28] sm:$0xff] }
 0x73f   :  { %v3469_v18 = vpop.f32.mrb[22].mxu0 }
 0x740   :  { %v2524_v2 = vadd.f32 %v3469_v18, %v3136_v21  ;;  %v2518_v17 = vpop.f32.mrb[23].mxu0  ;;  %v3683_v18 = vpack.c.bf16 %v2833_v4, %v2832_v26 }
 0x741   :  { %v2519_v23 = vadd.f32 %v3136_v21, %v2518_v17 }
 0x742   :  { %v2538_v8 = vmax.f32 %v2524_v2, 0.0  ;;  %v2835_v2 = vld [vmem:[%s4757_s7 + $0x38] sm:$0xff] }
 0x743   :  { %v2537_v28 = vmax.f32 %v2519_v23, 0.0  ;;  %v3472_v13 = vpop.f32.mrb[24].mxu0 }
 0x744   :  { %v2534_v10 = vadd.f32 %v3472_v13, %v3136_v21  ;;  %v2528_v33 = vpop.f32.mrb[25].mxu0 }
 0x745   :  { %v2529_v34 = vadd.f32 %v3136_v21, %v2528_v33  ;;  %3481 = vmatprep.mubr.msk.f32.mxu1 %vm115_vm0, %v2537_v28  ;;  %v2834_v21 = vld [vmem:[%s4757_s7 + $0x30] sm:$0xff] }
 0x746   :  { %3482 = vmatmul.mubr.msk.f32.vlgmr.msra.gmra.mrb[14].mxu1 %vm115_vm0, %v2538_v8  ;;  %v2540_v39 = vmax.f32 %v2534_v10, 0.0  ;;  %v3687_v17 = vpack.c.bf16 %v2835_v2, %v2834_v21 }
 0x747   :  { %v2539_v38 = vmax.f32 %v2529_v34, 0.0  ;;  %3670 = vmatpush3.bf16.msra.mxu1 %v3667_v57  ;;  %v3679_v57 = vpack.c.bf16 %v2831_v7, %v2830_v25 }
 0x748   :  { %3672 = vmatprep.subr.bf16.mxu1 %v3671_v15 }
 0x749   :  { %3484 = vmatprep.mubr.msk.f32.mxu1 %vm115_vm0, %v2539_v38  ;;  %3680 = vmatprep.subr.bf16.mxu0 %v3679_v57 }
 0x74a   :  { %3485 = vmatmul.mubr.msk.f32.gmra.mrb[16].mxu1 %vm115_vm0, %v2540_v39  ;;  %3682 = vmatpush3.bf16.msra.mxu0 %v3679_v57 }
 0x74b   :  { %3674 = vmatpush3.bf16.msra.mxu1 %v3671_v15  ;;  %3495 = vmatprep.mubr.msk.f32.mxu1 %vm115_vm0, %v2038_v29  ;;  %v3150_v29 = vld [vmem:[%s4759_s9 + $0x1] ss:$0 sm:$0xff] }
 0x74c   :  { %3684 = vmatprep.subr.bf16.mxu0 %v3683_v18 }
 0x74e   :  { %3496 = vmatmul.mubr.msk.f32.vlgmr.msra.gmra.mrb[14].mxu1 %vm115_vm0, %v2043_v53  ;;  %3686 = vmatpush3.bf16.msra.mxu0 %v3683_v18 }
 0x74f   :  { %3498 = vmatprep.mubr.msk.f32.mxu1 %vm115_vm0, %v2048_v45  ;;  %3688 = vmatprep.subr.bf16.mxu0 %v3687_v17 }
 0x752   :  { %3499 = vmatmul.mubr.msk.f32.gmra.mrb[16].mxu1 %vm115_vm0, %v2053_v49  ;;  %3690 = vmatpush3.bf16.msra.mxu0 %v3687_v17 }
 0x821   :  { %v3497_v50 = vpop.f32.mrb[14].mxu1 }
 0x822   :  { %v2749_v47 = vadd.f32 %v3497_v50, %v3149_v22  ;;  %v2724_v31 = vpop.f32.mrb[15].mxu1 }
 0x823   :  { %v2748_v43 = vadd.f32 %v3149_v22, %v2724_v31 }
 0x824   :  { %v2756_v30 = vsel %vm2752_vm5, %v2749_v47, 0.0 }
 0x825   :  { %2757 = vadd.xlane.f32.xlu1 %v2756_v30  ;;  %v3500_v52 = vpop.f32.mrb[16].mxu1  ;;  %v2753_v54 = vsel %vm2752_vm5, %v2748_v43, 0.0 }
 0x826   :  { %v2751_v55 = vadd.f32 %v3500_v52, %v3149_v22  ;;  %2754 = vadd.xlane.f32.xlu0 %v2753_v54  ;;  %v2734_v46 = vpop.f32.mrb[17].mxu1 }
 0x827   :  { %v2750_v58 = vadd.f32 %v3149_v22, %v2734_v46  ;;  %v3151_v22 = vld [vmem:[%s4759_s9 + $0x2] ss:$0 sm:$0xff] }
 0x828   :  { %v2762_v40 = vsel %vm2752_vm5, %v2751_v55, 0.0 }
 0x829   :  { %2763 = vadd.xlane.f32.xlu1 %v2762_v40  ;;  %v2759_v56 = vsel %vm2752_vm5, %v2750_v58, 0.0 }
 0x82a   :  { %2760 = vadd.xlane.f32.xlu0 %v2759_v56 }
 0x8b2   :  { %v2758_v3 = vpop.xlane.xlu1 %2757 }
 0x8b3   :  { %v2767_v48 = vmul.f32 0.015625, %v2758_v3  ;;  %v2755_v5 = vpop.xlane.xlu0 %2754 }
 0x8b4   :  { %v2766_v59 = vmul.f32 0.015625, %v2755_v5 }
 0x8b5   :  { %v2771_v41 = vsub.f32 %v2749_v47, %v2767_v48 }
 0x8b6   :  { %v2770_v37 = vsub.f32 %v2748_v43, %v2766_v59  ;;  %v2764_v42 = vpop.xlane.xlu1 %2763 }
 0x8b7   :  { %v2769_v60 = vmul.f32 0.015625, %v2764_v42  ;;  %v2761_v61 = vpop.xlane.xlu0 %2760  ;;  %v2775_v62 = vmul.f32 %v2771_v41, %v2771_v41 }
 0x8b8   :  { %v2768_v63 = vmul.f32 0.015625, %v2761_v61  ;;  %v2774_v36 = vmul.f32 %v2770_v37, %v2770_v37 }
 0x8b9   :  { %v2773_v0 = vsub.f32 %v2751_v55, %v2769_v60  ;;  %v2781_v1 = vsel %vm2752_vm5, %v2775_v62, 0.0  ;;  %v3797_v62 = vld [vmem:[#allocation2 + $0x8] sm:$0xff] }
 0x8ba   :  { %v2772_v6 = vsub.f32 %v2750_v58, %v2768_v63  ;;  %2782 = vadd.xlane.f32.xlu1 %v2781_v1  ;;  %v2778_v51 = vsel %vm2752_vm5, %v2774_v36, 0.0 }
 0x8bb   :  { %2779 = vadd.xlane.f32.xlu0 %v2778_v51  ;;  %v2777_v9 = vmul.f32 %v2773_v0, %v2773_v0 }
 0x8bc   :  { %v2776_v19 = vmul.f32 %v2772_v6, %v2772_v6 }
 0x8bd   :  { %v2787_v12 = vsel %vm2752_vm5, %v2777_v9, 0.0 }
 0x8be   :  { %2788 = vadd.xlane.f32.xlu1 %v2787_v12  ;;  %v2784_v20 = vsel %vm2752_vm5, %v2776_v19, 0.0 }
 0x8bf   :  { %2785 = vadd.xlane.f32.xlu0 %v2784_v20  ;;  %v3798_v20 = vld [vmem:[#allocation2 + $0x10] sm:$0xff] }
 0x947   :  { %v2783_v23 = vpop.xlane.xlu1 %2782 }
 0x948   :  { %v2791_v27 = vmul.f32 0.015625, %v2783_v23  ;;  %v2780_v24 = vpop.xlane.xlu0 %2779 }
 0x949   :  { %v2790_v28 = vmul.f32 0.015625, %v2780_v24 }
 0x94a   :  { %v2795_v13 = vadd.f32 1e-05, %v2791_v27 }
 0x94b   :  { %v2794_v8 = vadd.f32 1e-05, %v2790_v28  ;;  %v2789_v10 = vpop.xlane.xlu1 %2788 }
 0x94c   :  { %3779 = vrsqrt.f32 %v2795_v13  ;;  %v2793_v33 = vmul.f32 0.015625, %v2789_v10  ;;  %v2786_v15 = vpop.xlane.xlu0 %2785 }
 0x94d   :  { %3781 = vrsqrt.f32 %v2794_v8  ;;  %v2792_v34 = vmul.f32 0.015625, %v2786_v15 }
 0x94e   :  { %v2797_v35 = vadd.f32 1e-05, %v2793_v33 }
 0x94f   :  { %v2796_v38 = vadd.f32 1e-05, %v2792_v34 }
 0x950   :  { %3783 = vrsqrt.f32 %v2797_v35 }
 0x951   :  { %3785 = vrsqrt.f32 %v2796_v38 }
 0x956   :  { %v3780_v39 = vpop.eup %3779 }
 0x957   :  { %v3782_v53 = vpop.eup %3781  ;;  %v2803_v45 = vmul.f32 %v3780_v39, %v2771_v41  ;;  %v3152_v41 = vld [vmem:[%s4758_s8 + $0x3] ss:$0 sm:$0xff] }
 0x958   :  { %v2802_v49 = vmul.f32 %v3782_v53, %v2770_v37 }
 0x959   :  { %v2812_v50 = vmul.f32 %v3150_v29, %v2803_v45 }
 0x95a   :  { %v3784_v47 = vpop.eup %3783  ;;  %v2811_v31 = vmul.f32 %v3150_v29, %v2802_v49 }
 0x95b   :  { %v3786_v43 = vpop.eup %3785  ;;  %v2821_v30 = vadd.f32 %v3151_v22, %v2812_v50  ;;  %v2805_v52 = vmul.f32 %v3784_v47, %v2773_v0 }
 0x95c   :  { %v2820_v54 = vadd.f32 %v3151_v22, %v2811_v31  ;;  %v2804_v55 = vmul.f32 %v3786_v43, %v2772_v6 }
 0x95d   :  { %v2814_v46 = vmul.f32 %v3150_v29, %v2805_v52  ;;  %v2825_v56 = vmax.f32 %v2821_v30, 0.0  ;;  %v3157_v30 = vld [vmem:[%s4758_s8 + $0x4] ss:$0 sm:$0xff] }
 0x95e   :  { %v2824_v58 = vmax.f32 %v2820_v54, 0.0  ;;  %v2813_v40 = vmul.f32 %v3150_v29, %v2804_v55 }
 0x95f   :  { %v2823_v3 = vadd.f32 %v3151_v22, %v2814_v46  ;;  %v3158_v46 = vld [vmem:[%s4758_s8 + $0x5] ss:$0 sm:$0xff]  ;;  %s3909_s8 = scalar_lea.vmem %s3023_s3, 512 }
 0x960   :  { %3517 = vmatprep.mubr.msk.f32.mxu0 %vm2752_vm5, %v2824_v58  ;;  %v2822_v48 = vadd.f32 %v3151_v22, %v2813_v40  ;;  %p3910_p12 = scmp.ne.s32.totalorder %s3023_s3, %s3909_s8  ;;  %p3915_p0 = scmp.lt.s32.totalorder %s3909_s8, %s3909_s8 }
 0x961   :  { %3518 = vmatmul.mubr.msk.f32.vlgmr.msra.gmra.mrb[26].mxu0 %vm2752_vm5, %v2825_v56  ;;  %v2827_v59 = vmax.f32 %v2823_v3, 0.0 }
 0x962   :  { %v2826_v5 = vmax.f32 %v2822_v48, 0.0  ;;  %p3916_p1 = por %p3915_p0, %p3914_p13 }
 0x964   :  { %3520 = vmatprep.mubr.msk.f32.mxu0 %vm2752_vm5, %v2826_v5  ;;  %p3917_p2 = pnand %p3916_p1, %p3910_p12 }
 0x965   :  { %3521 = vmatmul.mubr.msk.f32.gmra.mrb[28].mxu0 %vm2752_vm5, %v2827_v59 }
 0xa34   :  { %v3519_v37 = vpop.f32.mrb[26].mxu0 }
 0xa35   :  { %v2925_v42 = vadd.f32 %v3519_v37, %v3152_v41  ;;  %v2919_v60 = vpop.f32.mrb[27].mxu0 }
 0xa36   :  { %v2920_v61 = vadd.f32 %v3152_v41, %v2919_v60 }
 0xa37   :  { %v2939_v63 = vadd.f32 %v3797_v62, %v2925_v42 }
 0xa38   :  { %v3522_v36 = vpop.f32.mrb[28].mxu0  ;;  %v2938_v0 = vadd.f32 %v4597_v44, %v2920_v61 }
 0xa39   :  { %v2935_v1 = vadd.f32 %v3522_v36, %v3152_v41  ;;  %v2929_v6 = vpop.f32.mrb[29].mxu0  ;;  %v2945_v51 = vsel %vm115_vm0, %v2939_v63, 0.0 }
 0xa3a   :  { %v2930_v9 = vadd.f32 %v3152_v41, %v2929_v6  ;;  %2946 = vadd.xlane.f32.xlu1 %v2945_v51  ;;  %v2942_v19 = vsel %vm115_vm0, %v2938_v0, 0.0 }
 0xa3b   :  { %2943 = vadd.xlane.f32.xlu0 %v2942_v19  ;;  %v2941_v12 = vadd.f32 %v4630_v32, %v2935_v1 }
 0xa3c   :  { %v2940_v11 = vadd.f32 %v3798_v20, %v2930_v9 }
 0xa3d   :  { %v2951_v14 = vsel %vm115_vm0, %v2941_v12, 0.0 }
 0xa3e   :  { %2952 = vadd.xlane.f32.xlu1 %v2951_v14  ;;  %v2948_v16 = vsel %vm115_vm0, %v2940_v11, 0.0 }
 0xa3f   :  { %2949 = vadd.xlane.f32.xlu0 %v2948_v16 }
 0xac7   :  { %v2947_v44 = vpop.xlane.xlu1 %2946 }
 0xac8   :  { %v2956_v25 = vmul.f32 0.03125, %v2947_v44  ;;  %v2944_v7 = vpop.xlane.xlu0 %2943 }
 0xac9   :  { %v2955_v57 = vmul.f32 0.03125, %v2944_v7 }
 0xaca   :  { %v2960_v26 = vsub.f32 %v2939_v63, %v2956_v25 }
 0xacb   :  { %v2959_v4 = vsub.f32 %v2938_v0, %v2955_v57  ;;  %v2953_v21 = vpop.xlane.xlu1 %2952 }
 0xacc   :  { %v2958_v18 = vmul.f32 0.03125, %v2953_v21  ;;  %v2950_v2 = vpop.xlane.xlu0 %2949  ;;  %v2964_v17 = vmul.f32 %v2960_v26, %v2960_v26 }
 0xacd   :  { %v2957_v23 = vmul.f32 0.03125, %v2950_v2  ;;  %v2963_v32 = vmul.f32 %v2959_v4, %v2959_v4 }
 0xace   :  { %v2962_v27 = vsub.f32 %v2941_v12, %v2958_v18  ;;  %v2970_v24 = vsel %vm115_vm0, %v2964_v17, 0.0 }
 0xacf   :  { %v2961_v28 = vsub.f32 %v2940_v11, %v2957_v23  ;;  %2971 = vadd.xlane.f32.xlu1 %v2970_v24  ;;  %v2967_v13 = vsel %vm115_vm0, %v2963_v32, 0.0 }
 0xad0   :  { %2968 = vadd.xlane.f32.xlu0 %v2967_v13  ;;  %v2966_v8 = vmul.f32 %v2962_v27, %v2962_v27 }
 0xad1   :  { %v2965_v10 = vmul.f32 %v2961_v28, %v2961_v28 }
 0xad2   :  { %v2976_v33 = vsel %vm115_vm0, %v2966_v8, 0.0 }
 0xad3   :  { %2977 = vadd.xlane.f32.xlu1 %v2976_v33  ;;  %v2973_v15 = vsel %vm115_vm0, %v2965_v10, 0.0 }
 0xad4   :  { %2974 = vadd.xlane.f32.xlu0 %v2973_v15 }
 0xb5c   :  { %v2972_v34 = vpop.xlane.xlu1 %2971 }
 0xb5d   :  { %v2980_v35 = vmul.f32 0.03125, %v2972_v34  ;;  %v2969_v38 = vpop.xlane.xlu0 %2968 }
 0xb5e   :  { %v2979_v39 = vmul.f32 0.03125, %v2969_v38 }
 0xb5f   :  { %v2984_v29 = vadd.f32 1e-05, %v2980_v35 }
 0xb60   :  { %v2983_v53 = vadd.f32 1e-05, %v2979_v39  ;;  %v2978_v45 = vpop.xlane.xlu1 %2977 }
 0xb61   :  { %3787 = vrsqrt.f32 %v2984_v29  ;;  %v2982_v49 = vmul.f32 0.03125, %v2978_v45  ;;  %v2975_v22 = vpop.xlane.xlu0 %2974 }
 0xb62   :  { %3789 = vrsqrt.f32 %v2983_v53  ;;  %v2981_v50 = vmul.f32 0.03125, %v2975_v22 }
 0xb63   :  { %v2986_v47 = vadd.f32 1e-05, %v2982_v49 }
 0xb64   :  { %v2985_v31 = vadd.f32 1e-05, %v2981_v50 }
 0xb65   :  { %3791 = vrsqrt.f32 %v2986_v47 }
 0xb66   :  { %3793 = vrsqrt.f32 %v2985_v31 }
 0xb6b   :  { %v3788_v43 = vpop.eup %3787 }
 0xb6c   :  { %v3790_v52 = vpop.eup %3789  ;;  %v2992_v54 = vmul.f32 %v3788_v43, %v2960_v26 }
 0xb6d   :  { %v2991_v55 = vmul.f32 %v3790_v52, %v2959_v4 }
 0xb6e   :  { %v3001_v58 = vmul.f32 %v3157_v30, %v2992_v54 }
 0xb6f   :  { %v3792_v40 = vpop.eup %3791  ;;  %v3000_v56 = vmul.f32 %v3157_v30, %v2991_v55 }
 0xb70   :  { %v3794_v3 = vpop.eup %3793  ;;  %v2994_v48 = vmul.f32 %v3792_v40, %v2962_v27  ;;  %v3010_v5 = vadd.f32 %v3158_v46, %v3001_v58 }
 0xb71   :  { %v2993_v59 = vmul.f32 %v3794_v3, %v2961_v28  ;;  %v3009_v41 = vadd.f32 %v3158_v46, %v3000_v56 }
 0xb72   :  { %v3003_v37 = vmul.f32 %v3157_v30, %v2994_v48  ;;  %3014 = vst.msk [vmem:[#allocation11 + $0x8] sm:$0xff] %vm115_vm0, %v3010_v5 }
 0xb73   :  { %v3002_v42 = vmul.f32 %v3157_v30, %v2993_v59  ;;  %3013 = vst.msk [vmem:[#allocation11] sm:$0xff] %vm115_vm0, %v3009_v41 }
 0xb74   :  { %v3012_v60 = vadd.f32 %v3158_v46, %v3003_v37 }
 0xb75   :  { %v3011_v61 = vadd.f32 %v3158_v46, %v3002_v42 }
 0xb76   :  { %3016 = vst.msk [vmem:[#allocation11 + $0x18] sm:$0xff] %vm115_vm0, %v3012_v60 }
 0xb77   :  { %3015 = vst.msk [vmem:[#allocation11 + $0x10] sm:$0xff] %vm115_vm0, %v3011_v61 }
 0xb78   :  { %3920 = shalt.err (!%p3917_p2)
}
 0xb79   :  { %s3921_s1 = scalar_lea.hbm %s4760_s10, 512 }
 0xb7a   :  { %p3922_p3 = scmp.ne.s32.totalorder %s4760_s10, %s3921_s1  ;;  %p3925_p4 = scmp.lt.u32.totalorder %s3921_s1, %s4760_s10 }
 0xb7c   :  { %p3927_p5 = pnand %p3925_p4, %p3922_p3 }
 0xb7e   :  { %3930 = shalt.err (!%p3927_p5)
}
 0xb7f   :  { %3028 = dma.vmem_to_hbm [thread:$0]  %s3023_s3, 512, %s4760_s10, [#allocation4], %s3942_s14, %s3942_s14, %s3943_s17  }
 0xb80   :  { %3937 = dma.done.wait [#allocation4], 512  }
 0xb81   :  { %3938 = vsyncadd [#allocation4], 4294966784 }
 0xb82   :  { %3032 = vsyncpa [#allocation3], 1 }
 0xb83   :  { %3033 = vsyncpa [#allocation6], 1 }
 0xb84   :  { %3034 = vsyncpa [#allocation9], 1 }
 0xb85   :  { %3035 = vsyncpa [#allocation4], 1 }

</bundles_post_ra>
